<compile_context>
chip_gen: v6e
topology: v6e:2x2x1
jax: 0.10.0
libtpu: 0.0.40
codegen_flags: <defaults>
</compile_context>

<pallas_src>
import functools

import jax
import jax.numpy as jnp
import numpy as np
from jax.experimental import pallas as pl
from jax.experimental.pallas import tpu as pltpu

# ----------------------------------------------------------------------------
# Small instantiation of the (parameterised) ConvNet module.
# ----------------------------------------------------------------------------
INPUT_CHANNELS = 24
CHANNELS = 32
HIDDEN = 2
OUTPUT_BINS = 8
KERNEL_SIZE = 5
PADDING = 2
DILATION = 1
BN_EPS = 1e-5

BATCH = 2
HSIZE = 8
WSIZE = 8

OUT_LANES = 128          # lane-dense padded width of the output tile (W*O=64 -> 128)


# ----------------------------------------------------------------------------
# Fused Pallas kernel: whole forward pass, VMEM resident, no grid.
# ----------------------------------------------------------------------------
def _fused_forward_kernel(x_ref, win_ref, bin_ref, t_ref, bh_ref,
                          wout_ref, bout_ref, o_ref, *,
                          n_batch, hsize, n_hidden, ksize, pad, dilation):
    f32 = jnp.float32
    bf16 = jnp.bfloat16
    rows = n_batch * hsize
    wc = bin_ref.shape[-1]                      # W * CHANNELS (lane-dense 256)

    # Row-within-batch index (computed once, VPU).  Used to mask rows whose
    # 5x5-conv source row falls outside the image / crosses a batch boundary.
    row_idx = jax.lax.broadcasted_iota(jnp.int32, (rows, wc), 0)
    if (hsize & (hsize - 1)) == 0:
        row_in_batch = jnp.bitwise_and(row_idx, hsize - 1)
    else:
        row_in_batch = jax.lax.rem(row_idx, hsize)

    # ---- input 1x1 conv: bnInp + convInp + bn1 folded into a block-diag weight.
    # bf16 operands on the MXU, f32 accumulate; bias/relu in f32.
    a = jnp.dot(x_ref[...].astype(bf16), win_ref[...], preferred_element_type=f32)
    a = jnp.maximum(a + bin_ref[...], 0.0)

    # ---- HIDDEN x [5x5 conv (+ folded BN) + relu]
    for i in range(n_hidden):
        # One matmul per layer against the hstacked block-Toeplitz weight:
        # (rows, W*C) @ (W*C, K*W*C) -> (rows, K*W*C); kw taps + channel
        # contraction are folded into the K dimension, kh taps into the columns.
        p = jnp.dot(a.astype(bf16), t_ref[i], preferred_element_type=f32)

        acc = None
        for kh in range(ksize):
            blk = p[:, kh * wc:(kh + 1) * wc]   # aligned lane slice (multiple of 256)
            d = kh * dilation - pad             # source-row offset for this kh tap
            if d == 0:
                term = blk                      # identity (center) tap
            else:
                # Row shift on the XLU (sublane roll) + VPU mask.  term[r] must be
                # blk[r + d]; roll(shift=s)[r] = blk[r - s]  =>  s = -d (mod rows).
                shifted = pltpu.roll(blk, shift=(-d) % rows, axis=0)
                hi = row_in_batch + d           # source row within the image
                valid = jnp.logical_and(hi >= 0, hi < hsize)
                term = jnp.where(valid, shifted, 0.0)
            acc = term if acc is None else acc + term
        a = jnp.maximum(acc + bh_ref[i], 0.0)

    # ---- output 1x1 conv (block-diag weight, zero-padded to 128 lanes):
    # (rows, W*C) @ (W*C, 128)
    z = jnp.dot(a.astype(bf16), wout_ref[...], preferred_element_type=f32) + bout_ref[...]

    # ---- log_softmax over dim=0 (the batch axis), exactly as the PyTorch module.
    # Rows are (b, h); the reduction runs across the B aligned row-blocks.
    parts = [z[b * hsize:(b + 1) * hsize, :] for b in range(n_batch)]
    m = functools.reduce(jnp.maximum, parts)
    sum_exp = functools.reduce(jnp.add, [jnp.exp(pp - m) for pp in parts])
    log_den = m + jnp.log(sum_exp)
    for b in range(n_batch):
        o_ref[b * hsize:(b + 1) * hsize, :] = parts[b] - log_den


def convnet_forward(ops, x_nchw):
    """ops: preprocessed weights (see build_kernel_operands). x: (B, Cin, H, W)."""
    B, Cin, H, W = x_nchw.shape
    # NCHW -> NHWC -> (B*H, W*Cin): layout plumbing only, done outside the kernel.
    x2 = jnp.transpose(x_nchw, (0, 2, 3, 1)).astype(jnp.float32).reshape(B * H, W * Cin)

    kern = functools.partial(
        _fused_forward_kernel, n_batch=B, hsize=H, n_hidden=HIDDEN,
        ksize=KERNEL_SIZE, pad=PADDING, dilation=DILATION)

    vmem = pl.BlockSpec(memory_space=pltpu.MemorySpace.VMEM)
    out = pl.pallas_call(
        kern,
        out_shape=jax.ShapeDtypeStruct((B * H, OUT_LANES), jnp.float32),
        in_specs=[vmem] * 7,
        out_specs=vmem,
    )(x2, ops["win"], ops["bin"], ops["t_hidden"], ops["b_hidden"],
      ops["wout"], ops["bout"])

    out = out[:, :W * OUTPUT_BINS].reshape(B, H, W, OUTPUT_BINS)
    return jnp.transpose(out, (0, 3, 1, 2))  # NHWC -> NCHW (matches PyTorch output)


# ----------------------------------------------------------------------------
# Deterministic parameter initialization (shapes per the module's __init__).
# ----------------------------------------------------------------------------
class _KeyGen:
    def __init__(self, key):
        self.key = key

    def __call__(self):
        self.key, sub = jax.random.split(self.key)
        return sub


def init_params(seed=0):
    kg = _KeyGen(jax.random.PRNGKey(seed))

    def bn_affine(C):
        gamma = 1.0 + 0.05 * jax.random.normal(kg(), (C,), jnp.float32)
        beta = 0.05 * jax.random.normal(kg(), (C,), jnp.float32)
        mean = 0.05 * jax.random.normal(kg(), (C,), jnp.float32)
        var = 1.0 + 0.05 * jax.random.uniform(kg(), (C,), jnp.float32)
        scale = gamma * jax.lax.rsqrt(var + BN_EPS)
        bias = beta - mean * scale
        return scale, bias

    def conv_w(Cin, Cout, K):
        fan_in = Cin * K * K
        w = jax.random.normal(kg(), (K, K, Cin, Cout), jnp.float32) / np.sqrt(fan_in)
        b = 0.01 * jax.random.normal(kg(), (Cout,), jnp.float32)
        return w, b

    p = {}

    # bnInp (pre-affine of first 1x1 conv) + convInp + bn1 (post-affine, folded with conv bias)
    bnInp_s, bnInp_b = bn_affine(INPUT_CHANNELS)
    wInp, bInp = conv_w(INPUT_CHANNELS, CHANNELS, 1)
    bn1_s, bn1_b = bn_affine(CHANNELS)
    p["bnInp_s"] = bnInp_s.reshape(1, -1)
    p["bnInp_b"] = bnInp_b.reshape(1, -1)
    p["wInp"] = wInp.reshape(INPUT_CHANNELS, CHANNELS)
    p["postInp_s"] = bn1_s.reshape(1, -1)
    p["postInp_b"] = (bn1_s * bInp + bn1_b).reshape(1, -1)

    # hidden 5x5 convs, each followed by a folded BatchNorm
    p["w_hidden"], p["post_s_hidden"], p["post_b_hidden"] = [], [], []
    for _ in range(HIDDEN):
        w, b = conv_w(CHANNELS, CHANNELS, KERNEL_SIZE)
        s, t = bn_affine(CHANNELS)
        p["w_hidden"].append(w)
        p["post_s_hidden"].append(s.reshape(1, -1))
        p["post_b_hidden"].append((s * b + t).reshape(1, -1))

    # output 1x1 conv (no BN after it)
    wOut, bOut = conv_w(CHANNELS, OUTPUT_BINS, 1)
    p["wOut"] = wOut.reshape(CHANNELS, OUTPUT_BINS)
    p["bOut"] = bOut.reshape(1, -1)
    return p


# ----------------------------------------------------------------------------
# Host-side weight preprocessing: fold BN affines into weights and build the
# block-diagonal / block-Toeplitz matrices used by the fused kernel.
# Matmul weights are stored in bf16 (DMA-bound kernel); biases stay f32.
# ----------------------------------------------------------------------------
def build_kernel_operands(params):
    eye_w = np.eye(WSIZE, dtype=np.float32)
    WC = WSIZE * CHANNELS

    # ---- input layer: (x*sI + bI) @ W * s1 + b1  ==  x @ W' + b'
    sI = np.asarray(params["bnInp_s"])[0]
    bI = np.asarray(params["bnInp_b"])[0]
    wInp = np.asarray(params["wInp"])
    s1 = np.asarray(params["postInp_s"])[0]
    b1 = np.asarray(params["postInp_b"])[0]
    w_in = (sI[:, None] * wInp) * s1[None, :]                     # (Cin, C)
    b_in = (bI @ wInp) * s1 + b1                                  # (C,)
    win_blk = np.kron(eye_w, w_in).astype(np.float32)             # (W*Cin, W*C)
    bin_flat = np.tile(b_in, WSIZE)[None, :].astype(np.float32)   # (1, W*C)

    # ---- hidden layers: conv(x, w)*s + t  ==  conv(x, w*s) + t
    # Per layer, hstack the KERNEL_SIZE block-Toeplitz kh-blocks into (WC, K*WC).
    t_list, bh_list = [], []
    for i in range(HIDDEN):
        w = np.asarray(params["w_hidden"][i])                     # (K,K,C,C) HWIO
        s = np.asarray(params["post_s_hidden"][i])[0]
        t = np.asarray(params["post_b_hidden"][i])[0]
        wf = (w * s[None, None, None, :]).astype(np.float32)
        T_cat = np.zeros((WC, KERNEL_SIZE * WC), np.float32)
        for kh in range(KERNEL_SIZE):
            col0 = kh * WC
            for wo in range(WSIZE):
                for kw in range(KERNEL_SIZE):
                    wi = wo - PADDING + kw * DILATION
                    if 0 <= wi < WSIZE:
                        T_cat[wi * CHANNELS:(wi + 1) * CHANNELS,
                              col0 + wo * CHANNELS:col0 + (wo + 1) * CHANNELS] = wf[kh, kw]
        t_list.append(T_cat)
        bh_list.append(np.tile(t, WSIZE)[None, :].astype(np.float32))
    t_hidden = np.stack(t_list)                                    # (HIDDEN, WC, K*WC)
    b_hidden = np.stack(bh_list)                                   # (HIDDEN, 1, WC)

    # ---- output layer (zero-padded to a lane-dense 128-column tile)
    wOut = np.asarray(params["wOut"])
    bOut = np.asarray(params["bOut"])[0]
    wout_blk = np.zeros((WC, OUT_LANES), np.float32)
    wout_blk[:, :WSIZE * OUTPUT_BINS] = np.kron(eye_w, wOut)       # (W*C, 128)
    bout_flat = np.zeros((1, OUT_LANES), np.float32)
    bout_flat[0, :WSIZE * OUTPUT_BINS] = np.tile(bOut, WSIZE)      # (1, 128)

    return {
        "win": jnp.asarray(win_blk, dtype=jnp.bfloat16),
        "bin": jnp.asarray(bin_flat),                              # f32
        "t_hidden": jnp.asarray(t_hidden, dtype=jnp.bfloat16),
        "b_hidden": jnp.asarray(b_hidden),                         # f32
        "wout": jnp.asarray(wout_blk, dtype=jnp.bfloat16),
        "bout": jnp.asarray(bout_flat),                            # f32
    }


# ----------------------------------------------------------------------------
# Pure-JAX f32 reference (same folded parameters) for correctness checking.
# ----------------------------------------------------------------------------
def reference_forward(params, x_nchw):
    x = jnp.transpose(x_nchw, (0, 2, 3, 1)).astype(jnp.float32)
    x = x * params["bnInp_s"][0] + params["bnInp_b"][0]
    z = jnp.einsum("bhwc,co->bhwo", x, params["wInp"])
    z = z * params["postInp_s"][0] + params["postInp_b"][0]
    x = jnp.maximum(z, 0.0)
    for i in range(HIDDEN):
        z = jax.lax.conv_general_dilated(
            x, params["w_hidden"][i], (1, 1),
            [(PADDING, PADDING), (PADDING, PADDING)],
            rhs_dilation=(DILATION, DILATION),
            dimension_numbers=("NHWC", "HWIO", "NHWC"))
        z = z * params["post_s_hidden"][i][0] + params["post_b_hidden"][i][0]
        x = jnp.maximum(z, 0.0)
    z = jnp.einsum("bhwc,co->bhwo", x, params["wOut"]) + params["bOut"][0]
    out = jax.nn.log_softmax(z, axis=0)
    return jnp.transpose(out, (0, 3, 1, 2))


if __name__ == "__main__":
    params = init_params(seed=0)
    ops = build_kernel_operands(params)
    x = jax.random.normal(jax.random.PRNGKey(0),
                          (BATCH, INPUT_CHANNELS, HSIZE, WSIZE), jnp.float32)

    out = jax.jit(convnet_forward)(ops, x)
    out = jax.block_until_ready(out)
    assert out.shape == (BATCH, OUTPUT_BINS, HSIZE, WSIZE)
    assert bool(jnp.all(jnp.isfinite(out)))

    # Reference is pure f32; the kernel uses bf16 matmul operands with f32
    # accumulation, so the tolerance is quantization-aware (4 matmul layers of
    # bf16 rounding).  Structural bugs (Toeplitz/roll/mask/log_softmax) would
    # produce O(1) errors and are still caught by this check.
    ref = reference_forward(params, x)
    np.testing.assert_allclose(np.asarray(out), np.asarray(ref), atol=5e-2, rtol=5e-2)

    print("KERNEL_OK")
</pallas_src>

<mosaic_0001>
module attributes {stable_mosaic.version = 11 : i64} {
  func.func @_fused_forward_kernel(%arg0: memref<16x192xf32, #tpu.memory_space<vmem>>, %arg1: memref<192x256xbf16, #tpu.memory_space<vmem>>, %arg2: memref<1x256xf32, #tpu.memory_space<vmem>>, %arg3: memref<2x256x1280xbf16, #tpu.memory_space<vmem>>, %arg4: memref<2x1x256xf32, #tpu.memory_space<vmem>>, %arg5: memref<256x128xbf16, #tpu.memory_space<vmem>>, %arg6: memref<1x128xf32, #tpu.memory_space<vmem>>, %arg7: memref<16x128xf32, #tpu.memory_space<vmem>>) attributes {dimension_semantics = [], scalar_prefetch = 0 : i64, scratch_operands = 0 : i64, tpu.core_type = #tpu.core_type<tc>} {
    %0 = tpu.iota {dimensions = array<i32: 0>} : vector<16x256xi32>
    %c7_i32 = arith.constant 7 : i32
    %1 = vector.broadcast %c7_i32 : i32 to vector<16x256xi32>
    %2 = arith.andi %0, %1 : vector<16x256xi32>
    %c0 = arith.constant 0 : index
    %c0_0 = arith.constant 0 : index
    %3 = vector.load %arg0[%c0, %c0_0] : memref<16x192xf32, #tpu.memory_space<vmem>>, vector<16x192xf32>
    %4 = arith.truncf %3 : vector<16x192xf32> to vector<16x192xbf16>
    %c0_1 = arith.constant 0 : index
    %c0_2 = arith.constant 0 : index
    %5 = vector.load %arg1[%c0_1, %c0_2] : memref<192x256xbf16, #tpu.memory_space<vmem>>, vector<192x256xbf16>
    %cst = arith.constant dense<0.000000e+00> : vector<16x256xf32>
    %6 = tpu.matmul %4, %5, %cst {dimension_numbers = #tpu.dot_dimension_numbers<[1], [0], [0], [1], [0, 0, 1, 1], [], []>} : vector<16x192xbf16>, vector<192x256xbf16>, vector<16x256xf32> -> vector<16x256xf32>
    %c0_3 = arith.constant 0 : index
    %c0_4 = arith.constant 0 : index
    %7 = vector.load %arg2[%c0_3, %c0_4] : memref<1x256xf32, #tpu.memory_space<vmem>>, vector<1x256xf32>
    %8 = vector.broadcast %7 : vector<1x256xf32> to vector<16x256xf32>
    %9 = arith.addf %6, %8 : vector<16x256xf32>
    %cst_5 = arith.constant 0.000000e+00 : f32
    %10 = vector.broadcast %cst_5 : f32 to vector<16x256xf32>
    %11 = arith.maximumf %9, %10 : vector<16x256xf32>
    %12 = arith.truncf %11 : vector<16x256xf32> to vector<16x256xbf16>
    %c0_6 = arith.constant 0 : index
    %c0_7 = arith.constant 0 : index
    %c0_8 = arith.constant 0 : index
    %13 = vector.load %arg3[%c0_6, %c0_7, %c0_8] : memref<2x256x1280xbf16, #tpu.memory_space<vmem>>, vector<1x256x1280xbf16>
    %14 = vector.shape_cast %13 : vector<1x256x1280xbf16> to vector<256x1280xbf16>
    %cst_9 = arith.constant dense<0.000000e+00> : vector<16x1280xf32>
    %15 = tpu.matmul %12, %14, %cst_9 {dimension_numbers = #tpu.dot_dimension_numbers<[1], [0], [0], [1], [0, 0, 1, 1], [], []>} : vector<16x256xbf16>, vector<256x1280xbf16>, vector<16x1280xf32> -> vector<16x1280xf32>
    %16 = vector.extract_strided_slice %15 {offsets = [0, 0], sizes = [16, 256], strides = [1, 1]} : vector<16x1280xf32> to vector<16x256xf32>
    %c2_i32 = arith.constant 2 : i32
    %17 = tpu.dynamic_rotate %16 by %c2_i32 dim 0 : vector<16x256xf32>, i32 -> vector<16x256xf32>
    %c-2_i32 = arith.constant -2 : i32
    %18 = vector.broadcast %c-2_i32 : i32 to vector<16x256xi32>
    %19 = arith.addi %2, %18 : vector<16x256xi32>
    %c0_i32 = arith.constant 0 : i32
    %20 = vector.broadcast %c0_i32 : i32 to vector<16x256xi32>
    %21 = arith.cmpi sge, %19, %20 : vector<16x256xi32>
    %c8_i32 = arith.constant 8 : i32
    %22 = vector.broadcast %c8_i32 : i32 to vector<16x256xi32>
    %23 = arith.cmpi slt, %19, %22 : vector<16x256xi32>
    %24 = arith.andi %21, %23 : vector<16x256xi1>
    %cst_10 = arith.constant 0.000000e+00 : f32
    %25 = vector.broadcast %cst_10 : f32 to vector<16x256xf32>
    %26 = arith.select %24, %17, %25 : vector<16x256xi1>, vector<16x256xf32>
    %27 = vector.extract_strided_slice %15 {offsets = [0, 256], sizes = [16, 256], strides = [1, 1]} : vector<16x1280xf32> to vector<16x256xf32>
    %c1_i32 = arith.constant 1 : i32
    %28 = tpu.dynamic_rotate %27 by %c1_i32 dim 0 : vector<16x256xf32>, i32 -> vector<16x256xf32>
    %c-1_i32 = arith.constant -1 : i32
    %29 = vector.broadcast %c-1_i32 : i32 to vector<16x256xi32>
    %30 = arith.addi %2, %29 : vector<16x256xi32>
    %c0_i32_11 = arith.constant 0 : i32
    %31 = vector.broadcast %c0_i32_11 : i32 to vector<16x256xi32>
    %32 = arith.cmpi sge, %30, %31 : vector<16x256xi32>
    %c8_i32_12 = arith.constant 8 : i32
    %33 = vector.broadcast %c8_i32_12 : i32 to vector<16x256xi32>
    %34 = arith.cmpi slt, %30, %33 : vector<16x256xi32>
    %35 = arith.andi %32, %34 : vector<16x256xi1>
    %cst_13 = arith.constant 0.000000e+00 : f32
    %36 = vector.broadcast %cst_13 : f32 to vector<16x256xf32>
    %37 = arith.select %35, %28, %36 : vector<16x256xi1>, vector<16x256xf32>
    %38 = arith.addf %26, %37 : vector<16x256xf32>
    %39 = vector.extract_strided_slice %15 {offsets = [0, 512], sizes = [16, 256], strides = [1, 1]} : vector<16x1280xf32> to vector<16x256xf32>
    %40 = arith.addf %38, %39 : vector<16x256xf32>
    %41 = vector.extract_strided_slice %15 {offsets = [0, 768], sizes = [16, 256], strides = [1, 1]} : vector<16x1280xf32> to vector<16x256xf32>
    %c15_i32 = arith.constant 15 : i32
    %42 = tpu.dynamic_rotate %41 by %c15_i32 dim 0 : vector<16x256xf32>, i32 -> vector<16x256xf32>
    %c1_i32_14 = arith.constant 1 : i32
    %43 = vector.broadcast %c1_i32_14 : i32 to vector<16x256xi32>
    %44 = arith.addi %2, %43 : vector<16x256xi32>
    %c0_i32_15 = arith.constant 0 : i32
    %45 = vector.broadcast %c0_i32_15 : i32 to vector<16x256xi32>
    %46 = arith.cmpi sge, %44, %45 : vector<16x256xi32>
    %c8_i32_16 = arith.constant 8 : i32
    %47 = vector.broadcast %c8_i32_16 : i32 to vector<16x256xi32>
    %48 = arith.cmpi slt, %44, %47 : vector<16x256xi32>
    %49 = arith.andi %46, %48 : vector<16x256xi1>
    %cst_17 = arith.constant 0.000000e+00 : f32
    %50 = vector.broadcast %cst_17 : f32 to vector<16x256xf32>
    %51 = arith.select %49, %42, %50 : vector<16x256xi1>, vector<16x256xf32>
    %52 = arith.addf %40, %51 : vector<16x256xf32>
    %53 = vector.extract_strided_slice %15 {offsets = [0, 1024], sizes = [16, 256], strides = [1, 1]} : vector<16x1280xf32> to vector<16x256xf32>
    %c14_i32 = arith.constant 14 : i32
    %54 = tpu.dynamic_rotate %53 by %c14_i32 dim 0 : vector<16x256xf32>, i32 -> vector<16x256xf32>
    %c2_i32_18 = arith.constant 2 : i32
    %55 = vector.broadcast %c2_i32_18 : i32 to vector<16x256xi32>
    %56 = arith.addi %2, %55 : vector<16x256xi32>
    %c0_i32_19 = arith.constant 0 : i32
    %57 = vector.broadcast %c0_i32_19 : i32 to vector<16x256xi32>
    %58 = arith.cmpi sge, %56, %57 : vector<16x256xi32>
    %c8_i32_20 = arith.constant 8 : i32
    %59 = vector.broadcast %c8_i32_20 : i32 to vector<16x256xi32>
    %60 = arith.cmpi slt, %56, %59 : vector<16x256xi32>
    %61 = arith.andi %58, %60 : vector<16x256xi1>
    %cst_21 = arith.constant 0.000000e+00 : f32
    %62 = vector.broadcast %cst_21 : f32 to vector<16x256xf32>
    %63 = arith.select %61, %54, %62 : vector<16x256xi1>, vector<16x256xf32>
    %64 = arith.addf %52, %63 : vector<16x256xf32>
    %c0_22 = arith.constant 0 : index
    %c0_23 = arith.constant 0 : index
    %c0_24 = arith.constant 0 : index
    %65 = vector.load %arg4[%c0_22, %c0_23, %c0_24] : memref<2x1x256xf32, #tpu.memory_space<vmem>>, vector<1x1x256xf32>
    %66 = vector.shape_cast %65 : vector<1x1x256xf32> to vector<1x256xf32>
    %67 = vector.broadcast %66 : vector<1x256xf32> to vector<16x256xf32>
    %68 = arith.addf %64, %67 : vector<16x256xf32>
    %cst_25 = arith.constant 0.000000e+00 : f32
    %69 = vector.broadcast %cst_25 : f32 to vector<16x256xf32>
    %70 = arith.maximumf %68, %69 : vector<16x256xf32>
    %71 = arith.truncf %70 : vector<16x256xf32> to vector<16x256xbf16>
    %c1 = arith.constant 1 : index
    %c0_26 = arith.constant 0 : index
    %c0_27 = arith.constant 0 : index
    %72 = vector.load %arg3[%c1, %c0_26, %c0_27] : memref<2x256x1280xbf16, #tpu.memory_space<vmem>>, vector<1x256x1280xbf16>
    %73 = vector.shape_cast %72 : vector<1x256x1280xbf16> to vector<256x1280xbf16>
    %cst_28 = arith.constant dense<0.000000e+00> : vector<16x1280xf32>
    %74 = tpu.matmul %71, %73, %cst_28 {dimension_numbers = #tpu.dot_dimension_numbers<[1], [0], [0], [1], [0, 0, 1, 1], [], []>} : vector<16x256xbf16>, vector<256x1280xbf16>, vector<16x1280xf32> -> vector<16x1280xf32>
    %75 = vector.extract_strided_slice %74 {offsets = [0, 0], sizes = [16, 256], strides = [1, 1]} : vector<16x1280xf32> to vector<16x256xf32>
    %c2_i32_29 = arith.constant 2 : i32
    %76 = tpu.dynamic_rotate %75 by %c2_i32_29 dim 0 : vector<16x256xf32>, i32 -> vector<16x256xf32>
    %c-2_i32_30 = arith.constant -2 : i32
    %77 = vector.broadcast %c-2_i32_30 : i32 to vector<16x256xi32>
    %78 = arith.addi %2, %77 : vector<16x256xi32>
    %c0_i32_31 = arith.constant 0 : i32
    %79 = vector.broadcast %c0_i32_31 : i32 to vector<16x256xi32>
    %80 = arith.cmpi sge, %78, %79 : vector<16x256xi32>
    %c8_i32_32 = arith.constant 8 : i32
    %81 = vector.broadcast %c8_i32_32 : i32 to vector<16x256xi32>
    %82 = arith.cmpi slt, %78, %81 : vector<16x256xi32>
    %83 = arith.andi %80, %82 : vector<16x256xi1>
    %cst_33 = arith.constant 0.000000e+00 : f32
    %84 = vector.broadcast %cst_33 : f32 to vector<16x256xf32>
    %85 = arith.select %83, %76, %84 : vector<16x256xi1>, vector<16x256xf32>
    %86 = vector.extract_strided_slice %74 {offsets = [0, 256], sizes = [16, 256], strides = [1, 1]} : vector<16x1280xf32> to vector<16x256xf32>
    %c1_i32_34 = arith.constant 1 : i32
    %87 = tpu.dynamic_rotate %86 by %c1_i32_34 dim 0 : vector<16x256xf32>, i32 -> vector<16x256xf32>
    %c-1_i32_35 = arith.constant -1 : i32
    %88 = vector.broadcast %c-1_i32_35 : i32 to vector<16x256xi32>
    %89 = arith.addi %2, %88 : vector<16x256xi32>
    %c0_i32_36 = arith.constant 0 : i32
    %90 = vector.broadcast %c0_i32_36 : i32 to vector<16x256xi32>
    %91 = arith.cmpi sge, %89, %90 : vector<16x256xi32>
    %c8_i32_37 = arith.constant 8 : i32
    %92 = vector.broadcast %c8_i32_37 : i32 to vector<16x256xi32>
    %93 = arith.cmpi slt, %89, %92 : vector<16x256xi32>
    %94 = arith.andi %91, %93 : vector<16x256xi1>
    %cst_38 = arith.constant 0.000000e+00 : f32
    %95 = vector.broadcast %cst_38 : f32 to vector<16x256xf32>
    %96 = arith.select %94, %87, %95 : vector<16x256xi1>, vector<16x256xf32>
    %97 = arith.addf %85, %96 : vector<16x256xf32>
    %98 = vector.extract_strided_slice %74 {offsets = [0, 512], sizes = [16, 256], strides = [1, 1]} : vector<16x1280xf32> to vector<16x256xf32>
    %99 = arith.addf %97, %98 : vector<16x256xf32>
    %100 = vector.extract_strided_slice %74 {offsets = [0, 768], sizes = [16, 256], strides = [1, 1]} : vector<16x1280xf32> to vector<16x256xf32>
    %c15_i32_39 = arith.constant 15 : i32
    %101 = tpu.dynamic_rotate %100 by %c15_i32_39 dim 0 : vector<16x256xf32>, i32 -> vector<16x256xf32>
    %c1_i32_40 = arith.constant 1 : i32
    %102 = vector.broadcast %c1_i32_40 : i32 to vector<16x256xi32>
    %103 = arith.addi %2, %102 : vector<16x256xi32>
    %c0_i32_41 = arith.constant 0 : i32
    %104 = vector.broadcast %c0_i32_41 : i32 to vector<16x256xi32>
    %105 = arith.cmpi sge, %103, %104 : vector<16x256xi32>
    %c8_i32_42 = arith.constant 8 : i32
    %106 = vector.broadcast %c8_i32_42 : i32 to vector<16x256xi32>
    %107 = arith.cmpi slt, %103, %106 : vector<16x256xi32>
    %108 = arith.andi %105, %107 : vector<16x256xi1>
    %cst_43 = arith.constant 0.000000e+00 : f32
    %109 = vector.broadcast %cst_43 : f32 to vector<16x256xf32>
    %110 = arith.select %108, %101, %109 : vector<16x256xi1>, vector<16x256xf32>
    %111 = arith.addf %99, %110 : vector<16x256xf32>
    %112 = vector.extract_strided_slice %74 {offsets = [0, 1024], sizes = [16, 256], strides = [1, 1]} : vector<16x1280xf32> to vector<16x256xf32>
    %c14_i32_44 = arith.constant 14 : i32
    %113 = tpu.dynamic_rotate %112 by %c14_i32_44 dim 0 : vector<16x256xf32>, i32 -> vector<16x256xf32>
    %c2_i32_45 = arith.constant 2 : i32
    %114 = vector.broadcast %c2_i32_45 : i32 to vector<16x256xi32>
    %115 = arith.addi %2, %114 : vector<16x256xi32>
    %c0_i32_46 = arith.constant 0 : i32
    %116 = vector.broadcast %c0_i32_46 : i32 to vector<16x256xi32>
    %117 = arith.cmpi sge, %115, %116 : vector<16x256xi32>
    %c8_i32_47 = arith.constant 8 : i32
    %118 = vector.broadcast %c8_i32_47 : i32 to vector<16x256xi32>
    %119 = arith.cmpi slt, %115, %118 : vector<16x256xi32>
    %120 = arith.andi %117, %119 : vector<16x256xi1>
    %cst_48 = arith.constant 0.000000e+00 : f32
    %121 = vector.broadcast %cst_48 : f32 to vector<16x256xf32>
    %122 = arith.select %120, %113, %121 : vector<16x256xi1>, vector<16x256xf32>
    %123 = arith.addf %111, %122 : vector<16x256xf32>
    %c1_49 = arith.constant 1 : index
    %c0_50 = arith.constant 0 : index
    %c0_51 = arith.constant 0 : index
    %124 = vector.load %arg4[%c1_49, %c0_50, %c0_51] : memref<2x1x256xf32, #tpu.memory_space<vmem>>, vector<1x1x256xf32>
    %125 = vector.shape_cast %124 : vector<1x1x256xf32> to vector<1x256xf32>
    %126 = vector.broadcast %125 : vector<1x256xf32> to vector<16x256xf32>
    %127 = arith.addf %123, %126 : vector<16x256xf32>
    %cst_52 = arith.constant 0.000000e+00 : f32
    %128 = vector.broadcast %cst_52 : f32 to vector<16x256xf32>
    %129 = arith.maximumf %127, %128 : vector<16x256xf32>
    %130 = arith.truncf %129 : vector<16x256xf32> to vector<16x256xbf16>
    %c0_53 = arith.constant 0 : index
    %c0_54 = arith.constant 0 : index
    %131 = vector.load %arg5[%c0_53, %c0_54] : memref<256x128xbf16, #tpu.memory_space<vmem>>, vector<256x128xbf16>
    %cst_55 = arith.constant dense<0.000000e+00> : vector<16x128xf32>
    %132 = tpu.matmul %130, %131, %cst_55 {dimension_numbers = #tpu.dot_dimension_numbers<[1], [0], [0], [1], [0, 0, 1, 1], [], []>} : vector<16x256xbf16>, vector<256x128xbf16>, vector<16x128xf32> -> vector<16x128xf32>
    %c0_56 = arith.constant 0 : index
    %c0_57 = arith.constant 0 : index
    %133 = vector.load %arg6[%c0_56, %c0_57] : memref<1x128xf32, #tpu.memory_space<vmem>>, vector<1x128xf32>
    %134 = vector.broadcast %133 : vector<1x128xf32> to vector<16x128xf32>
    %135 = arith.addf %132, %134 : vector<16x128xf32>
    %136 = vector.extract_strided_slice %135 {offsets = [0, 0], sizes = [8, 128], strides = [1, 1]} : vector<16x128xf32> to vector<8x128xf32>
    %137 = vector.extract_strided_slice %135 {offsets = [8, 0], sizes = [8, 128], strides = [1, 1]} : vector<16x128xf32> to vector<8x128xf32>
    %138 = arith.maximumf %136, %137 : vector<8x128xf32>
    %139 = arith.subf %136, %138 : vector<8x128xf32>
    %140 = math.exp %139 : vector<8x128xf32>
    %141 = arith.subf %137, %138 : vector<8x128xf32>
    %142 = math.exp %141 : vector<8x128xf32>
    %143 = arith.addf %140, %142 : vector<8x128xf32>
    %144 = math.log %143 : vector<8x128xf32>
    %145 = arith.addf %138, %144 : vector<8x128xf32>
    %146 = arith.subf %136, %145 : vector<8x128xf32>
    %c0_58 = arith.constant 0 : index
    %c0_59 = arith.constant 0 : index
    %147 = vector.load %arg7[%c0_58, %c0_59] : memref<16x128xf32, #tpu.memory_space<vmem>>, vector<8x128xf32>
    tpu.vector_store %arg7[%c0_58, %c0_59], %146 {strides = array<i32>} : memref<16x128xf32, #tpu.memory_space<vmem>>, vector<8x128xf32>,
    %148 = arith.subf %137, %145 : vector<8x128xf32>
    %c8 = arith.constant 8 : index
    %c0_60 = arith.constant 0 : index
    %149 = vector.load %arg7[%c8, %c0_60] : memref<16x128xf32, #tpu.memory_space<vmem>>, vector<8x128xf32>
    tpu.vector_store %arg7[%c8, %c0_60], %148 {strides = array<i32>} : memref<16x128xf32, #tpu.memory_space<vmem>>, vector<8x128xf32>,
    return
  }
}

</mosaic_0001>

<bundles_post_ra>
// kernel: convnet_forward.1
= control target key start
LH: loop header
LB: loop body
LE: loop exit
PB: predicated region body
PF: predicated region fallthrough
CT: control target
= control target key end

     0   :  { %12 = vsyncpa [#allocation3], 0  ;;  %s4444_s0 = inlined_call_operand.vmem [shape: f32[16,192], index: 0, kind: input, shape index: {}]   ;;  %s4445_s1 = inlined_call_operand.hbm [shape: bf16[192,256], index: 1, kind: input, shape index: {}]   ;;  %s4446_s2 = inlined_call_operand.hbm [shape: f32[1,256], index: 2, kind: input, shape index: {}]   ;;  %s4447_s3 = inlined_call_operand.hbm [shape: bf16[2,256,1280], index: 3, kind: input, shape index: {}]   ;;  %s4448_s4 = inlined_call_operand.hbm [shape: f32[2,1,256], index: 4, kind: input, shape index: {}]   ;;  %s4449_s5 = inlined_call_operand.hbm [shape: bf16[256,128], index: 5, kind: input, shape index: {}]   ;;  %s4450_s6 = inlined_call_operand.hbm [shape: f32[1,128], index: 6, kind: input, shape index: {}]   ;;  %s4451_s7 = inlined_call_operand.vmem [shape: f32[16,128], index: 7, kind: output, shape index: {}]  }
   0x1   :  { %13 = vsyncpa [#allocation5], 0 }
   0x2   :  { %14 = vsyncpa [#allocation8], 0 }
   0x3   :  { %15 = vsyncpa [#allocation11], 0  ;;  %s4148_s24 = smov [#allocation4]   ;;  %s4149_s26 = smov [#allocation7]  }
   0x4   :  { %s36_s25 = sshll.u32 %s4148_s24, 4  ;;  %s57_s27 = sshll.u32 %s4149_s26, 4  ;;  %s37_s25 = int_to_ptr.vmem [resolvable:$true] %s36_s25  ;;  %s58_s27 = int_to_ptr.vmem [resolvable:$true] %s57_s27 }
   0x5   :  { %s4028_s28 = scalar_lea.vmem %s37_s25, 32  ;;  %p4033_p1 = scmp.lt.s32.totalorder %s37_s25, %s37_s25 }
   0x6   :  { %p4029_p0 = scmp.ne.s32.totalorder %s37_s25, %s4028_s28  ;;  %p4034_p2 = scmp.lt.s32.totalorder %s4028_s28, %s4028_s28 }
   0x8   :  { %p4035_p3 = por %p4034_p2, %p4033_p1 }
   0xa   :  { %p4036_p4 = pnand %p4035_p3, %p4029_p0 }
   0xc   :  { %4039 = shalt.err (!%p4036_p4)
}
   0xd   :  { %39 = dma.hbm_to_vmem [thread:$0]  %s4446_s2, 32, %s37_s25, [#allocation5]  }
   0xe   :  { %s4048_s8 = scalar_lea.vmem %s58_s27, 64  ;;  %p4053_p6 = scmp.lt.s32.totalorder %s58_s27, %s58_s27 }
   0xf   :  { %p4049_p5 = scmp.ne.s32.totalorder %s58_s27, %s4048_s8  ;;  %p4054_p7 = scmp.lt.s32.totalorder %s4048_s8, %s4048_s8 }
  0x11   :  { %p4055_p8 = por %p4054_p7, %p4053_p6 }
  0x13   :  { %p4056_p9 = pnand %p4055_p8, %p4049_p5 }
  0x15   :  { %4059 = shalt.err (!%p4056_p9)
}
  0x16   :  { %s4150_s9 = smov 32   ;;  %s4151_s10 = smov 2  }
  0x17   :  { %63 = dma.hbm_to_vmem [thread:$0]  %s4448_s4, 64, %s58_s27, [#allocation8], %s4150_s9, %s4150_s9, %s4151_s10  }
  0x18   :  { %s4152_s13 = smov [#allocation2]  }
  0x19   :  { %s23_s14 = sshll.u32 %s4152_s13, 4  ;;  %s24_s14 = int_to_ptr.vmem [resolvable:$true] %s23_s14 }
  0x1a   :  { %s4068_s15 = scalar_lea.vmem %s24_s14, 3072  ;;  %p4073_p11 = scmp.lt.s32.totalorder %s24_s14, %s24_s14 }
  0x1b   :  { %p4069_p10 = scmp.ne.s32.totalorder %s24_s14, %s4068_s15  ;;  %p4074_p12 = scmp.lt.s32.totalorder %s4068_s15, %s4068_s15 }
  0x1d   :  { %p4075_p13 = por %p4074_p12, %p4073_p11 }
  0x1f   :  { %p4076_p0 = pnand %p4075_p13, %p4069_p10 }
  0x21   :  { %4079 = shalt.err (!%p4076_p0)
}
  0x22   :  { %s4153_s2 = smov 128   ;;  %s4154_s16 = smov 8  }
  0x23   :  { %29 = dma.hbm_to_vmem [thread:$0]  %s4445_s1, 3072, %s24_s14, [#allocation3], %s4153_s2, %s4153_s2, %s4154_s16  }
  0x24   :  { %s4155_s19 = smov [#allocation6]  }
  0x25   :  { %s45_s20 = sshll.u32 %s4155_s19, 4  ;;  %s46_s20 = int_to_ptr.vmem [resolvable:$true] %s45_s20 }
  0x26   :  { %s4088_s4 = scalar_lea.vmem %s46_s20, 40960  ;;  %p4093_p2 = scmp.lt.s32.totalorder %s46_s20, %s46_s20 }
  0x27   :  { %p4089_p1 = scmp.ne.s32.totalorder %s46_s20, %s4088_s4  ;;  %p4094_p3 = scmp.lt.s32.totalorder %s4088_s4, %s4088_s4 }
  0x29   :  { %p4095_p4 = por %p4094_p3, %p4093_p2 }
  0x2b   :  { %p4096_p5 = pnand %p4095_p4, %p4089_p1 }
  0x2d   :  { %4099 = shalt.err (!%p4096_p5)
}
  0x2e   :  { %s4156_s21 = smov 640   ;;  %s4157_s22 = smov 40  }
  0x2f   :  { %51 = dma.hbm_to_vmem [thread:$0]  %s4447_s3, 40960, %s46_s20, [#allocation5], %s4156_s21, %s4156_s21, %s4157_s22  }
  0x30   :  { %s4158_s25 = smov [#allocation9]  }
  0x31   :  { %s69_s26 = sshll.u32 %s4158_s25, 4  ;;  %s70_s26 = int_to_ptr.vmem [resolvable:$true] %s69_s26 }
  0x32   :  { %s4108_s1 = scalar_lea.vmem %s70_s26, 2048  ;;  %p4113_p7 = scmp.lt.s32.totalorder %s70_s26, %s70_s26 }
  0x33   :  { %p4109_p6 = scmp.ne.s32.totalorder %s70_s26, %s4108_s1  ;;  %p4114_p8 = scmp.lt.s32.totalorder %s4108_s1, %s4108_s1 }
  0x35   :  { %p4115_p9 = por %p4114_p8, %p4113_p7 }
  0x37   :  { %p4116_p10 = pnand %p4115_p9, %p4109_p6 }
  0x39   :  { %4119 = shalt.err (!%p4116_p10)
}
  0x3a   :  { %s4159_s27 = smov 64   ;;  %s4160_s28 = smov 4  }
  0x3b   :  { %75 = dma.hbm_to_vmem [thread:$0]  %s4449_s5, 2048, %s70_s26, [#allocation8], %s4159_s27, %s4159_s27, %s4160_s28  }
  0x3c   :  { %s4161_s8 = smov [#allocation10]  }
  0x3d   :  { %s82_s9 = sshll.u32 %s4161_s8, 4  ;;  %s83_s9 = int_to_ptr.vmem [resolvable:$true] %s82_s9 }
  0x3e   :  { %s4128_s3 = scalar_lea.vmem %s83_s9, 16  ;;  %s4132_s10 = scalar_lea.vmem %s83_s9, 32 }
  0x3f   :  { %p4129_p11 = scmp.ne.s32.totalorder %s83_s9, %s4128_s3  ;;  %p4133_p12 = scmp.lt.s32.totalorder %s83_s9, %s83_s9 }
  0x40   :  { %p4134_p13 = scmp.lt.s32.totalorder %s4132_s10, %s4128_s3 }
  0x42   :  { %p4135_p0 = por %p4134_p13, %p4133_p12 }
  0x44   :  { %p4136_p1 = pnand %p4135_p0, %p4129_p11 }
  0x46   :  { %4139 = shalt.err (!%p4136_p1)
}
  0x47   :  { %85 = dma.hbm_to_vmem [thread:$0]  %s4450_s6, 16, %s83_s9, [#allocation11]  }
  0x48   :  { %4140 = dma.done.wait [#allocation3], 3072  }
  0x49   :  { %4141 = vsyncadd [#allocation3], 4294964224 }
  0x4a   :  { %4142 = dma.done.wait [#allocation5], 40992  }
  0x4b   :  { %4143 = vsyncadd [#allocation5], 4294926304 }
  0x4c   :  { %4144 = dma.done.wait [#allocation8], 2112  }
  0x4d   :  { %4145 = vsyncadd [#allocation8], 4294965184 }
  0x4e   :  { %4146 = dma.done.wait [#allocation11], 16  }
  0x4f   :  { %4147 = vsyncadd [#allocation11], 4294967280  ;;  %v3482_v0 = vld [vmem:[#allocation2 + $0x74] ss:$8 sps:$4 sm:$0xff]   ;;  %v3484_v1 = vld [vmem:[#allocation2 + $0x70] ss:$8 sps:$4 sm:$0xff]  }
  0x50   :  { %276 = vmatprep.subr.bf16.mxu0 %v3482_v0  ;;  %v3485_v2 = vld [vmem:[#allocation2 + $0x64] ss:$8 sps:$4 sm:$0xff]   ;;  %v3487_v3 = vld [vmem:[#allocation2 + $0x60] ss:$8 sps:$4 sm:$0xff]   ;;  %v3488_v4 = vld [vmem:[#allocation2 + $0x54] ss:$8 sps:$4 sm:$0xff]  }
  0x51   :  { %277 = vmatpush1.bf16.msra.mxu0 %v3484_v1  ;;  %v3490_v5 = vld [vmem:[#allocation2 + $0x50] ss:$8 sps:$4 sm:$0xff]   ;;  %v3491_v6 = vld [vmem:[#allocation2 + $0x44] ss:$8 sps:$4 sm:$0xff]   ;;  %v3493_v7 = vld [vmem:[#allocation2 + $0x40] ss:$8 sps:$4 sm:$0xff]  }
  0x52   :  { %278 = vmatprep.subr.bf16.mxu0 %v3485_v2  ;;  %v3494_v8 = vld [vmem:[#allocation2 + $0x34] ss:$8 sps:$4 sm:$0xff]   ;;  %v3496_v9 = vld [vmem:[#allocation2 + $0x30] ss:$8 sps:$4 sm:$0xff]   ;;  %v3497_v10 = vld [vmem:[#allocation2 + $0x24] ss:$8 sps:$4 sm:$0xff]  }
  0x53   :  { %v111_v11 = vld [vmem:[%s4444_s0 + $0x8] sm:$0xff]  ;;  %v113_v12 = vld [vmem:[%s4444_s0 + $0x18] sm:$0xff]  ;;  %vm272_vm0 = vcmask 523264   ;;  %v110_v42 = vld [vmem:[%s4444_s0] sm:$0xff] }
  0x54   :  { %v115_v13 = vpack.c.bf16 %v113_v12, %v111_v11  ;;  %v3518_v14 = vld [vmem:[#allocation6 + $0x234] ss:$40 sps:$4 sm:$0xff]   ;;  %v3523_v17 = vld [vmem:[#allocation6 + $0x230] ss:$40 sps:$4 sm:$0xff]   ;;  %v3524_v18 = vld [vmem:[#allocation6 + $0x1e4] ss:$40 sps:$4 sm:$0xff]  }
  0x55   :  { %279 = vmatpush1.bf16.msra.mxu0 %v3487_v3  ;;  %v3499_v15 = vld [vmem:[#allocation2 + $0x20] ss:$8 sps:$4 sm:$0xff]   ;;  %v3500_v16 = vld [vmem:[#allocation2 + $0x14] ss:$8 sps:$4 sm:$0xff]   ;;  %1285 = vmatprep.subr.bf16.mxu1 %v3518_v14  ;;  %v3502_v19 = vld [vmem:[#allocation2 + $0x10] ss:$8 sps:$4 sm:$0xff]  }
  0x56   :  { %280 = vmatprep.subr.bf16.mxu0 %v3488_v4  ;;  %3108 = vmatprep.mubr.msk.bf16.mxu0 %vm272_vm0, %v115_v13  ;;  %v3529_v20 = vld [vmem:[#allocation6 + $0x1e0] ss:$40 sps:$4 sm:$0xff]   ;;  %v3530_v21 = vld [vmem:[#allocation6 + $0x194] ss:$40 sps:$4 sm:$0xff]   ;;  %v3535_v23 = vld [vmem:[#allocation6 + $0x190] ss:$40 sps:$4 sm:$0xff]  }
  0x57   :  { %1286 = vmatpush1.bf16.msra.mxu1 %v3523_v17  ;;  %v3503_v22 = vld [vmem:[#allocation2 + $0x4] ss:$8 sps:$4 sm:$0xff]   ;;  %v3505_v25 = vld [vmem:[#allocation2] ss:$8 sps:$4 sm:$0xff]   ;;  %v3506_v26 = vld [vmem:[#allocation2 + $0xb4] ss:$8 sps:$4 sm:$0xff]  }
  0x58   :  { %1287 = vmatprep.subr.bf16.mxu1 %v3524_v18  ;;  %v3536_v24 = vld [vmem:[#allocation6 + $0x144] ss:$40 sps:$4 sm:$0xff]   ;;  %v3541_v27 = vld [vmem:[#allocation6 + $0x140] ss:$40 sps:$4 sm:$0xff]   ;;  %v3542_v28 = vld [vmem:[#allocation6 + $0xf4] ss:$40 sps:$4 sm:$0xff]  }
  0x59   :  { %281 = vmatpush1.bf16.msra.mxu0 %v3490_v5  ;;  %v3508_v29 = vld [vmem:[#allocation2 + $0xb0] ss:$8 sps:$4 sm:$0xff]   ;;  %v3509_v30 = vld [vmem:[#allocation2 + $0xa4] ss:$8 sps:$4 sm:$0xff]   ;;  %v3511_v33 = vld [vmem:[#allocation2 + $0xa0] ss:$8 sps:$4 sm:$0xff]  }
  0x5a   :  { %282 = vmatprep.subr.bf16.mxu0 %v3491_v6  ;;  %v3547_v31 = vld [vmem:[#allocation6 + $0xf0] ss:$40 sps:$4 sm:$0xff]   ;;  %v3548_v32 = vld [vmem:[#allocation6 + $0xa4] ss:$40 sps:$4 sm:$0xff]   ;;  %v3553_v35 = vld [vmem:[#allocation6 + $0xa0] ss:$40 sps:$4 sm:$0xff]  }
  0x5b   :  { %1288 = vmatpush1.bf16.msra.mxu1 %v3529_v20  ;;  %v3512_v34 = vld [vmem:[#allocation2 + $0x94] ss:$8 sps:$4 sm:$0xff]   ;;  %v3514_v37 = vld [vmem:[#allocation2 + $0x90] ss:$8 sps:$4 sm:$0xff]   ;;  %v3515_v38 = vld [vmem:[#allocation2 + $0x84] ss:$8 sps:$4 sm:$0xff]  }
  0x5c   :  { %1289 = vmatprep.subr.bf16.mxu1 %v3530_v21  ;;  %v3554_v36 = vld [vmem:[#allocation6 + $0x54] ss:$40 sps:$4 sm:$0xff]   ;;  %v3559_v39 = vld [vmem:[#allocation6 + $0x50] ss:$40 sps:$4 sm:$0xff]   ;;  %v3560_v40 = vld [vmem:[#allocation6 + $0x4] ss:$40 sps:$4 sm:$0xff]  }
  0x5d   :  { %283 = vmatpush1.bf16.msra.mxu0 %v3493_v7  ;;  %v3517_v41 = vld [vmem:[#allocation2 + $0x80] ss:$8 sps:$4 sm:$0xff]   ;;  %v112_v43 = vld [vmem:[%s4444_s0 + $0x10] sm:$0xff] }
  0x5e   :  { %284 = vmatprep.subr.bf16.mxu0 %v3494_v8  ;;  %v3522_v44 = vld [vmem:[#allocation6 + $0x23c] ss:$40 sps:$4 sm:$0xff]   ;;  %v3565_v45 = vld [vmem:[#allocation6] ss:$40 sps:$4 sm:$0xff]   ;;  %v114_v46 = vpack.c.bf16 %v112_v43, %v110_v42  ;;  %v3528_v49 = vld [vmem:[#allocation6 + $0x1ec] ss:$40 sps:$4 sm:$0xff]  }
  0x5f   :  { %1290 = vmatpush1.bf16.msra.mxu1 %v3535_v23  ;;  %v3566_v47 = vld [vmem:[#allocation6 + $0x4b4] ss:$40 sps:$4 sm:$0xff]   ;;  %v3520_v48 = vld [vmem:[#allocation6 + $0x238] ss:$40 sps:$4 sm:$0xff]   ;;  %v3572_v51 = vld [vmem:[#allocation6 + $0x464] ss:$40 sps:$4 sm:$0xff]  }
  0x60   :  { %1291 = vmatprep.subr.bf16.mxu1 %v3536_v24  ;;  %v3571_v50 = vld [vmem:[#allocation6 + $0x4b0] ss:$40 sps:$4 sm:$0xff]   ;;  %v3534_v53 = vld [vmem:[#allocation6 + $0x19c] ss:$40 sps:$4 sm:$0xff]   ;;  %v3577_v54 = vld [vmem:[#allocation6 + $0x460] ss:$40 sps:$4 sm:$0xff]  }
  0x61   :  { %285 = vmatpush1.bf16.msra.mxu0 %v3496_v9  ;;  %v3526_v52 = vld [vmem:[#allocation6 + $0x1e8] ss:$40 sps:$4 sm:$0xff]   ;;  %v3578_v55 = vld [vmem:[#allocation6 + $0x414] ss:$40 sps:$4 sm:$0xff]   ;;  %v3532_v56 = vld [vmem:[#allocation6 + $0x198] ss:$40 sps:$4 sm:$0xff]  }
  0x62   :  { %286 = vmatprep.subr.bf16.mxu0 %v3497_v10  ;;  %v3540_v57 = vld [vmem:[#allocation6 + $0x14c] ss:$40 sps:$4 sm:$0xff]   ;;  %v3583_v58 = vld [vmem:[#allocation6 + $0x410] ss:$40 sps:$4 sm:$0xff]   ;;  %v3546_v61 = vld [vmem:[#allocation6 + $0xfc] ss:$40 sps:$4 sm:$0xff]  }
  0x63   :  { %1292 = vmatpush1.bf16.msra.mxu1 %v3541_v27  ;;  %v3584_v59 = vld [vmem:[#allocation6 + $0x3c4] ss:$40 sps:$4 sm:$0xff]   ;;  %v3538_v60 = vld [vmem:[#allocation6 + $0x148] ss:$40 sps:$4 sm:$0xff]   ;;  %v3590_v63 = vld [vmem:[#allocation6 + $0x374] ss:$40 sps:$4 sm:$0xff]  }
  0x64   :  { %1293 = vmatprep.subr.bf16.mxu1 %v3542_v28  ;;  %v3589_v62 = vld [vmem:[#allocation6 + $0x3c0] ss:$40 sps:$4 sm:$0xff]   ;;  %v3552_v1 = vld [vmem:[#allocation6 + $0xac] ss:$40 sps:$4 sm:$0xff]   ;;  %v3595_v2 = vld [vmem:[#allocation6 + $0x370] ss:$40 sps:$4 sm:$0xff]  }
  0x65   :  { %287 = vmatpush1.bf16.msra.mxu0 %v3499_v15  ;;  %v3544_v0 = vld [vmem:[#allocation6 + $0xf8] ss:$40 sps:$4 sm:$0xff]   ;;  %v3550_v3 = vld [vmem:[#allocation6 + $0xa8] ss:$40 sps:$4 sm:$0xff]   ;;  %v3558_v4 = vld [vmem:[#allocation6 + $0x5c] ss:$40 sps:$4 sm:$0xff]  }
  0x66   :  { %288 = vmatprep.subr.bf16.mxu0 %v3500_v16  ;;  %v3556_v5 = vld [vmem:[#allocation6 + $0x58] ss:$40 sps:$4 sm:$0xff]   ;;  %v3564_v6 = vld [vmem:[#allocation6 + $0xc] ss:$40 sps:$4 sm:$0xff]   ;;  %v3562_v7 = vld [vmem:[#allocation6 + $0x8] ss:$40 sps:$4 sm:$0xff]  }
  0x67   :  { %1294 = vmatpush1.bf16.msra.mxu1 %v3547_v31  ;;  %v3570_v8 = vld [vmem:[#allocation6 + $0x4bc] ss:$40 sps:$4 sm:$0xff]   ;;  %v3568_v9 = vld [vmem:[#allocation6 + $0x4b8] ss:$40 sps:$4 sm:$0xff]   ;;  %v3576_v10 = vld [vmem:[#allocation6 + $0x46c] ss:$40 sps:$4 sm:$0xff]  }
  0x68   :  { %1295 = vmatprep.subr.bf16.mxu1 %v3548_v32  ;;  %v3574_v11 = vld [vmem:[#allocation6 + $0x468] ss:$40 sps:$4 sm:$0xff]   ;;  %v3582_v12 = vld [vmem:[#allocation6 + $0x41c] ss:$40 sps:$4 sm:$0xff]   ;;  %v3580_v13 = vld [vmem:[#allocation6 + $0x418] ss:$40 sps:$4 sm:$0xff]   ;;  %v105_v32 = vlaneseq }
  0x69   :  { %289 = vmatpush1.bf16.msra.mxu0 %v3502_v19  ;;  %v3588_v14 = vld [vmem:[#allocation6 + $0x3cc] ss:$40 sps:$4 sm:$0xff]   ;;  %v3586_v15 = vld [vmem:[#allocation6 + $0x3c8] ss:$40 sps:$4 sm:$0xff]   ;;  %v3594_v16 = vld [vmem:[#allocation6 + $0x37c] ss:$40 sps:$4 sm:$0xff]  }
  0x6a   :  { %290 = vmatprep.subr.bf16.mxu0 %v3503_v22  ;;  %v3592_v17 = vld [vmem:[#allocation6 + $0x378] ss:$40 sps:$4 sm:$0xff]   ;;  %v3596_v18 = vld [vmem:[#allocation6 + $0x324] ss:$40 sps:$4 sm:$0xff]   ;;  %v3598_v20 = vld [vmem:[#allocation6 + $0x328] ss:$40 sps:$4 sm:$0xff]  }
  0x6b   :  { %1296 = vmatpush1.bf16.msra.mxu1 %v3553_v35  ;;  %v3600_v19 = vld [vmem:[#allocation6 + $0x32c] ss:$40 sps:$4 sm:$0xff]   ;;  %v3601_v21 = vld [vmem:[#allocation6 + $0x320] ss:$40 sps:$4 sm:$0xff]   ;;  %v3606_v23 = vld [vmem:[#allocation6 + $0x2dc] ss:$40 sps:$4 sm:$0xff]  }
  0x6c   :  { %1297 = vmatprep.subr.bf16.mxu1 %v3554_v36  ;;  %v3602_v22 = vld [vmem:[#allocation6 + $0x2d4] ss:$40 sps:$4 sm:$0xff]   ;;  %v3604_v24 = vld [vmem:[#allocation6 + $0x2d8] ss:$40 sps:$4 sm:$0xff]   ;;  %v3610_v28 = vld [vmem:[#allocation6 + $0x288] ss:$40 sps:$4 sm:$0xff]  }
  0x6d   :  { %291 = vmatpush1.bf16.msra.mxu0 %v3505_v25  ;;  %v3607_v25 = vld [vmem:[#allocation6 + $0x2d0] ss:$40 sps:$4 sm:$0xff]   ;;  %v3612_v27 = vld [vmem:[#allocation6 + $0x28c] ss:$40 sps:$4 sm:$0xff]   ;;  %v140_v36 = vld [vmem:[#allocation4] sm:$0x3] }
  0x6e   :  { %300 = vmatprep.subr.bf16.mxu0 %v3506_v26  ;;  %v3608_v26 = vld [vmem:[#allocation6 + $0x284] ss:$40 sps:$4 sm:$0xff]  }
  0x6f   :  { %1298 = vmatpush1.bf16.msra.mxu1 %v3559_v39  ;;  %v3619_v31 = vld [vmem:[#allocation6 + $0x24c] ss:$40 sps:$4 sm:$0xff]  }
  0x70   :  { %1299 = vmatprep.subr.bf16.mxu1 %v3560_v40 }
  0x71   :  { %301 = vmatpush2.bf16.msra.mxu0 %v3508_v29  ;;  %v3613_v29 = vld [vmem:[#allocation6 + $0x280] ss:$40 sps:$4 sm:$0xff]  }
  0x72   :  { %302 = vmatprep.subr.bf16.mxu0 %v3509_v30  ;;  %v3616_v30 = vld [vmem:[#allocation6 + $0x244] ss:$40 sps:$4 sm:$0xff]  }
  0x73   :  { %1300 = vmatpush1.bf16.msra.mxu1 %v3565_v45 }
  0x74   :  { %1301 = vmatprep.subr.bf16.mxu1 %v3566_v47 }
  0x75   :  { %303 = vmatpush2.bf16.msra.mxu0 %v3511_v33  ;;  %v4232_v33 = vshrl.u32 %v105_v32, 7  ;;  %v3685_v32 = vld [vmem:[#allocation6 + $0x3dc] ss:$40 sps:$4 sm:$0xff]  }
  0x76   :  { %304 = vmatprep.subr.bf16.mxu0 %v3512_v34 }
  0x77   :  { %1302 = vmatpush2.bf16.msra.mxu1 %v3571_v50  ;;  %v4235_v34 = vsub.s32 1, %v4232_v33  ;;  %v4238_v35 = vsub.s32 0, %v4232_v33  ;;  %vm1504_vm1 = vcmp.lt.s32.totalorder %v4232_v33, 2  ;;  %vm1525_vm2 = vcmp.lt.s32.totalorder %v4232_v33, 1 }
  0x78   :  { %1303 = vmatprep.subr.bf16.mxu1 %v3572_v51  ;;  %vm1554_vm7 = vcmp.lt.s32.totalorder %v4232_v33, 7  ;;  %vm1579_vm10 = vcmp.lt.s32.totalorder %v4232_v33, 6 }
  0x79   :  { %305 = vmatpush2.bf16.msra.mxu0 %v3514_v37  ;;  %v145_v39 = vrot.slane %v140_v36, %v4238_v35 }
  0x7a   :  { %306 = vmatprep.subr.bf16.mxu0 %v3515_v38  ;;  %v149_v38 = vrot.slane %v140_v36, %v4235_v34  ;;  %v3680_v36 = vld [vmem:[#allocation6 + $0x3d0] ss:$40 sps:$4 sm:$0xff]  }
  0x7b   :  { %1304 = vmatpush2.bf16.msra.mxu1 %v3577_v54 }
  0x7c   :  { %1305 = vmatprep.subr.bf16.mxu1 %v3578_v55  ;;  %v3622_v55 = vld [vmem:[#allocation6 + $0x1f4] ss:$40 sps:$4 sm:$0xff]  }
  0x7d   :  { %307 = vmatpush2.bf16.msra.mxu0 %v3517_v41 }
  0x7e   :  { %1328 = vmatprep.subr.bf16.mxu0 %v3522_v44 }
  0x7f   :  { %1306 = vmatpush2.bf16.msra.mxu1 %v3583_v58  ;;  %v3623_v58 = vld [vmem:[#allocation6 + $0x1f8] ss:$40 sps:$4 sm:$0xff]  }
  0x80   :  { %309 = vmatmul.mubr.bf16.vlgmr.msra.gmra.mxu0 %v114_v46  ;;  %1307 = vmatprep.subr.bf16.mxu1 %v3584_v59  ;;  %v3628_v59 = vld [vmem:[#allocation6 + $0x1a4] ss:$40 sps:$4 sm:$0xff]  }
  0x81   :  { %1329 = vmatpush1.bf16.msra.mxu0 %v3520_v48 }
  0x82   :  { %1330 = vmatprep.subr.bf16.mxu0 %v3528_v49 }
  0x83   :  { %1308 = vmatpush2.bf16.msra.mxu1 %v3589_v62  ;;  %v3629_v62 = vld [vmem:[#allocation6 + $0x1a8] ss:$40 sps:$4 sm:$0xff]  }
  0x84   :  { %1309 = vmatprep.subr.bf16.mxu1 %v3590_v63  ;;  %v3634_v63 = vld [vmem:[#allocation6 + $0x154] ss:$40 sps:$4 sm:$0xff]  }
  0x85   :  { %1331 = vmatpush1.bf16.msra.mxu0 %v3526_v52  ;;  %v3614_v52 = vld [vmem:[#allocation6 + $0x240] ss:$40 sps:$4 sm:$0xff]  }
  0x86   :  { %1332 = vmatprep.subr.bf16.mxu0 %v3534_v53  ;;  %v3617_v53 = vld [vmem:[#allocation6 + $0x248] ss:$40 sps:$4 sm:$0xff]  }
  0x87   :  { %1310 = vmatpush2.bf16.msra.mxu1 %v3595_v2  ;;  %v3635_v2 = vld [vmem:[#allocation6 + $0x158] ss:$40 sps:$4 sm:$0xff]  }
  0x88   :  { %1311 = vmatprep.subr.bf16.mxu1 %v3596_v18  ;;  %v3659_v18 = vld [vmem:[#allocation6 + $0x18] ss:$40 sps:$4 sm:$0xff]  }
  0x89   :  { %1333 = vmatpush1.bf16.msra.mxu0 %v3532_v56  ;;  %v3625_v56 = vld [vmem:[#allocation6 + $0x1fc] ss:$40 sps:$4 sm:$0xff]  }
  0x8a   :  { %1334 = vmatprep.subr.bf16.mxu0 %v3540_v57  ;;  %v3620_v57 = vld [vmem:[#allocation6 + $0x1f0] ss:$40 sps:$4 sm:$0xff]  }
  0x8b   :  { %1312 = vmatpush2.bf16.msra.mxu1 %v3601_v21  ;;  %v3662_v21 = vld [vmem:[#allocation6 + $0x4c0] ss:$40 sps:$4 sm:$0xff]  }
  0x8c   :  { %1313 = vmatprep.subr.bf16.mxu1 %v3602_v22  ;;  %v3665_v22 = vld [vmem:[#allocation6 + $0x4c8] ss:$40 sps:$4 sm:$0xff]  }
  0x8d   :  { %1335 = vmatpush1.bf16.msra.mxu0 %v3538_v60  ;;  %v3631_v60 = vld [vmem:[#allocation6 + $0x1ac] ss:$40 sps:$4 sm:$0xff]  }
  0x8e   :  { %1336 = vmatprep.subr.bf16.mxu0 %v3546_v61  ;;  %v3626_v61 = vld [vmem:[#allocation6 + $0x1a0] ss:$40 sps:$4 sm:$0xff]  }
  0x8f   :  { %1314 = vmatpush2.bf16.msra.mxu1 %v3607_v25  ;;  %v3668_v25 = vld [vmem:[#allocation6 + $0x470] ss:$40 sps:$4 sm:$0xff]  }
  0x90   :  { %1315 = vmatprep.subr.bf16.mxu1 %v3608_v26  ;;  %v3671_v26 = vld [vmem:[#allocation6 + $0x478] ss:$40 sps:$4 sm:$0xff]  }
  0x91   :  { %1337 = vmatpush1.bf16.msra.mxu0 %v3544_v0  ;;  %v3637_v0 = vld [vmem:[#allocation6 + $0x15c] ss:$40 sps:$4 sm:$0xff]  }
  0x92   :  { %1338 = vmatprep.subr.bf16.mxu0 %v3552_v1  ;;  %v3632_v1 = vld [vmem:[#allocation6 + $0x150] ss:$40 sps:$4 sm:$0xff]  }
  0x93   :  { %1316 = vmatpush2.bf16.msra.mxu1 %v3613_v29  ;;  %v3674_v29 = vld [vmem:[#allocation6 + $0x420] ss:$40 sps:$4 sm:$0xff]  }
  0x94   :  { %1371 = vmatprep.subr.bf16.mxu1 %v3616_v30  ;;  %v3677_v30 = vld [vmem:[#allocation6 + $0x428] ss:$40 sps:$4 sm:$0xff]  }
  0x95   :  { %1339 = vmatpush1.bf16.msra.mxu0 %v3550_v3  ;;  %v3640_v3 = vld [vmem:[#allocation6 + $0x104] ss:$40 sps:$4 sm:$0xff]  }
  0x96   :  { %1340 = vmatprep.subr.bf16.mxu0 %v3558_v4  ;;  %v3643_v4 = vld [vmem:[#allocation6 + $0x10c] ss:$40 sps:$4 sm:$0xff]  }
  0x99   :  { %1341 = vmatpush1.bf16.msra.mxu0 %v3556_v5  ;;  %v3638_v5 = vld [vmem:[#allocation6 + $0x100] ss:$40 sps:$4 sm:$0xff]  }
  0x9a   :  { %1342 = vmatprep.subr.bf16.mxu0 %v3564_v6  ;;  %v3641_v6 = vld [vmem:[#allocation6 + $0x108] ss:$40 sps:$4 sm:$0xff]  }
  0x9d   :  { %1343 = vmatpush1.bf16.msra.mxu0 %v3562_v7  ;;  %v3646_v7 = vld [vmem:[#allocation6 + $0xb4] ss:$40 sps:$4 sm:$0xff]  }
  0x9e   :  { %1344 = vmatprep.subr.bf16.mxu0 %v3570_v8  ;;  %v3649_v8 = vld [vmem:[#allocation6 + $0xbc] ss:$40 sps:$4 sm:$0xff]  }
  0xa1   :  { %1345 = vmatpush2.bf16.msra.mxu0 %v3568_v9  ;;  %v3644_v9 = vld [vmem:[#allocation6 + $0xb0] ss:$40 sps:$4 sm:$0xff]  }
  0xa2   :  { %1346 = vmatprep.subr.bf16.mxu0 %v3576_v10  ;;  %v3647_v10 = vld [vmem:[#allocation6 + $0xb8] ss:$40 sps:$4 sm:$0xff]  }
  0xa5   :  { %1347 = vmatpush2.bf16.msra.mxu0 %v3574_v11  ;;  %v3652_v11 = vld [vmem:[#allocation6 + $0x64] ss:$40 sps:$4 sm:$0xff]  }
  0xa6   :  { %1348 = vmatprep.subr.bf16.mxu0 %v3582_v12  ;;  %v3655_v12 = vld [vmem:[#allocation6 + $0x6c] ss:$40 sps:$4 sm:$0xff]  }
  0xa9   :  { %1349 = vmatpush2.bf16.msra.mxu0 %v3580_v13  ;;  %v3650_v13 = vld [vmem:[#allocation6 + $0x60] ss:$40 sps:$4 sm:$0xff]  }
  0xaa   :  { %1350 = vmatprep.subr.bf16.mxu0 %v3588_v14  ;;  %v3653_v14 = vld [vmem:[#allocation6 + $0x68] ss:$40 sps:$4 sm:$0xff]  }
  0xad   :  { %1351 = vmatpush2.bf16.msra.mxu0 %v3586_v15  ;;  %v3658_v15 = vld [vmem:[#allocation6 + $0x14] ss:$40 sps:$4 sm:$0xff]  }
  0xae   :  { %1352 = vmatprep.subr.bf16.mxu0 %v3594_v16  ;;  %v3661_v16 = vld [vmem:[#allocation6 + $0x1c] ss:$40 sps:$4 sm:$0xff]  }
  0xb1   :  { %1353 = vmatpush2.bf16.msra.mxu0 %v3592_v17  ;;  %v3656_v17 = vld [vmem:[#allocation6 + $0x10] ss:$40 sps:$4 sm:$0xff]  }
  0xb2   :  { %1354 = vmatprep.subr.bf16.mxu0 %v3600_v19  ;;  %v3664_v19 = vld [vmem:[#allocation6 + $0x4c4] ss:$40 sps:$4 sm:$0xff]  }
  0xb5   :  { %1355 = vmatpush2.bf16.msra.mxu0 %v3598_v20  ;;  %v3667_v20 = vld [vmem:[#allocation6 + $0x4cc] ss:$40 sps:$4 sm:$0xff]  }
  0xb6   :  { %1356 = vmatprep.subr.bf16.mxu0 %v3606_v23  ;;  %v3670_v23 = vld [vmem:[#allocation6 + $0x474] ss:$40 sps:$4 sm:$0xff]  }
  0xb9   :  { %1357 = vmatpush2.bf16.msra.mxu0 %v3604_v24  ;;  %v3673_v24 = vld [vmem:[#allocation6 + $0x47c] ss:$40 sps:$4 sm:$0xff]  }
  0xba   :  { %1358 = vmatprep.subr.bf16.mxu0 %v3612_v27  ;;  %v3676_v27 = vld [vmem:[#allocation6 + $0x424] ss:$40 sps:$4 sm:$0xff]  }
  0xbd   :  { %1359 = vmatpush2.bf16.msra.mxu0 %v3610_v28  ;;  %v3679_v28 = vld [vmem:[#allocation6 + $0x42c] ss:$40 sps:$4 sm:$0xff]  }
  0xbe   :  { %1414 = vmatprep.subr.bf16.mxu0 %v3619_v31  ;;  %v3682_v31 = vld [vmem:[#allocation6 + $0x3d4] ss:$40 sps:$4 sm:$0xff]  }
 0x140   :  { %v310_v37 = vpop.f32.mrf.mxu0 }
 0x141   :  { %v311_v44 = vadd.f32 %v310_v37, %v145_v39  ;;  %v3683_v37 = vld [vmem:[#allocation6 + $0x3d8] ss:$40 sps:$4 sm:$0xff]  }
 0x142   :  { %v312_v40 = vpop.f32.mrf.mxu0 }
 0x143   :  { %v313_v42 = vadd.f32 %v312_v40, %v149_v38  ;;  %v319_v50 = vmax.f32 %v311_v44, 0.0  ;;  %v3686_v40 = vld [vmem:[#allocation6 + $0x380] ss:$40 sps:$4 sm:$0xff]   ;;  %v3692_v44 = vld [vmem:[#allocation6 + $0x330] ss:$40 sps:$4 sm:$0xff]  }
 0x144   :  { %v314_v41 = vpop.f32.mrf.mxu0 }
 0x145   :  { %v315_v43 = vadd.f32 %v314_v41, %v145_v39  ;;  %v320_v48 = vmax.f32 %v313_v42, 0.0  ;;  %v3691_v39 = vld [vmem:[#allocation6 + $0x38c] ss:$40 sps:$4 sm:$0xff]   ;;  %v3689_v41 = vld [vmem:[#allocation6 + $0x388] ss:$40 sps:$4 sm:$0xff]  }
 0x146   :  { %v316_v45 = vpop.f32.mrf.mxu0  ;;  %v3694_v42 = vld [vmem:[#allocation6 + $0x334] ss:$40 sps:$4 sm:$0xff]  }
 0x147   :  { %v317_v46 = vadd.f32 %v316_v45, %v149_v38  ;;  %v321_v47 = vmax.f32 %v315_v43, 0.0  ;;  %v3688_v38 = vld [vmem:[#allocation6 + $0x384] ss:$40 sps:$4 sm:$0xff]   ;;  %v3695_v45 = vld [vmem:[#allocation6 + $0x338] ss:$40 sps:$4 sm:$0xff]  }
 0x148   :  { %v3697_v43 = vld [vmem:[#allocation6 + $0x33c] ss:$40 sps:$4 sm:$0xff]  }
 0x149   :  { %v322_v49 = vmax.f32 %v317_v46, 0.0  ;;  %v4244_v54 = vpack.c.bf16 %v321_v47, %v319_v50  ;;  %v3700_v46 = vld [vmem:[#allocation6 + $0x2e4] ss:$40 sps:$4 sm:$0xff]   ;;  %v3706_v50 = vld [vmem:[#allocation6 + $0x294] ss:$40 sps:$4 sm:$0xff]  }
 0x14a   :  { %v3703_v47 = vld [vmem:[#allocation6 + $0x2ec] ss:$40 sps:$4 sm:$0xff]  }
 0x14b   :  { %v4242_v51 = vpack.c.bf16 %v322_v49, %v320_v48  ;;  %v3698_v48 = vld [vmem:[#allocation6 + $0x2e0] ss:$40 sps:$4 sm:$0xff]  }
 0x14c   :  { %v3701_v49 = vld [vmem:[#allocation6 + $0x2e8] ss:$40 sps:$4 sm:$0xff]  }
 0x14d   :  { %1317 = vmatprep.mubr.bf16.mxu1 %v4242_v51  ;;  %1360 = vmatprep.mubr.bf16.mxu0 %v4242_v51 }
 0x14e   :  { %1318 = vmatmul.mubr.bf16.vlgmr.msra.gmra.mxu1 %v4244_v54  ;;  %1361 = vmatmul.mubr.bf16.vlgmr.msra.gmra.mxu0 %v4244_v54 }
 0x14f   :  { %1372 = vmatpush1.bf16.msra.mxu1 %v3614_v52  ;;  %1415 = vmatpush1.bf16.msra.mxu0 %v3617_v53  ;;  %v3709_v52 = vld [vmem:[#allocation6 + $0x29c] ss:$40 sps:$4 sm:$0xff]   ;;  %v3704_v53 = vld [vmem:[#allocation6 + $0x290] ss:$40 sps:$4 sm:$0xff]  }
 0x150   :  { %1403 = vmatprep.mubr.bf16.mxu1 %v4242_v51  ;;  %1446 = vmatprep.mubr.bf16.mxu0 %v4242_v51 }
 0x151   :  { %1373 = vmatprep.subr.bf16.mxu1 %v3622_v55  ;;  %1416 = vmatprep.subr.bf16.mxu0 %v3625_v56  ;;  %v3707_v55 = vld [vmem:[#allocation6 + $0x298] ss:$40 sps:$4 sm:$0xff]   ;;  %v3712_v56 = vld [vmem:[#allocation6 + $0x254] ss:$40 sps:$4 sm:$0xff]  }
 0x153   :  { %1374 = vmatpush1.bf16.msra.mxu1 %v3620_v57  ;;  %1417 = vmatpush1.bf16.msra.mxu0 %v3623_v58  ;;  %v3710_v57 = vld [vmem:[#allocation6 + $0x250] ss:$40 sps:$4 sm:$0xff]   ;;  %v3715_v58 = vld [vmem:[#allocation6 + $0x204] ss:$40 sps:$4 sm:$0xff]  }
 0x154   :  { %1375 = vmatprep.subr.bf16.mxu1 %v3628_v59  ;;  %1418 = vmatprep.subr.bf16.mxu0 %v3631_v60  ;;  %v3713_v59 = vld [vmem:[#allocation6 + $0x200] ss:$40 sps:$4 sm:$0xff]   ;;  %v3718_v60 = vld [vmem:[#allocation6 + $0x1b4] ss:$40 sps:$4 sm:$0xff]  }
 0x157   :  { %1376 = vmatpush1.bf16.msra.mxu1 %v3626_v61  ;;  %1419 = vmatpush1.bf16.msra.mxu0 %v3629_v62  ;;  %v3716_v61 = vld [vmem:[#allocation6 + $0x1b0] ss:$40 sps:$4 sm:$0xff]   ;;  %v3721_v62 = vld [vmem:[#allocation6 + $0x164] ss:$40 sps:$4 sm:$0xff]  }
 0x158   :  { %1377 = vmatprep.subr.bf16.mxu1 %v3634_v63  ;;  %1420 = vmatprep.subr.bf16.mxu0 %v3637_v0  ;;  %v3719_v63 = vld [vmem:[#allocation6 + $0x160] ss:$40 sps:$4 sm:$0xff]   ;;  %v3724_v0 = vld [vmem:[#allocation6 + $0x114] ss:$40 sps:$4 sm:$0xff]  }
 0x15b   :  { %1378 = vmatpush1.bf16.msra.mxu1 %v3632_v1  ;;  %1421 = vmatpush1.bf16.msra.mxu0 %v3635_v2  ;;  %v3722_v1 = vld [vmem:[#allocation6 + $0x110] ss:$40 sps:$4 sm:$0xff]   ;;  %v3727_v2 = vld [vmem:[#allocation6 + $0xc4] ss:$40 sps:$4 sm:$0xff]  }
 0x15c   :  { %1379 = vmatprep.subr.bf16.mxu1 %v3640_v3  ;;  %1422 = vmatprep.subr.bf16.mxu0 %v3643_v4  ;;  %v3725_v3 = vld [vmem:[#allocation6 + $0xc0] ss:$40 sps:$4 sm:$0xff]   ;;  %v3730_v4 = vld [vmem:[#allocation6 + $0x74] ss:$40 sps:$4 sm:$0xff]  }
 0x15f   :  { %1380 = vmatpush1.bf16.msra.mxu1 %v3638_v5  ;;  %1423 = vmatpush1.bf16.msra.mxu0 %v3641_v6  ;;  %v3733_v5 = vld [vmem:[#allocation6 + $0x24] ss:$40 sps:$4 sm:$0xff]   ;;  %v3731_v6 = vld [vmem:[#allocation6 + $0x20] ss:$40 sps:$4 sm:$0xff]  }
 0x160   :  { %1381 = vmatprep.subr.bf16.mxu1 %v3646_v7  ;;  %1424 = vmatprep.subr.bf16.mxu0 %v3649_v8  ;;  %v3736_v7 = vld [vmem:[#allocation6 + $0x4d4] ss:$40 sps:$4 sm:$0xff]   ;;  %v3734_v8 = vld [vmem:[#allocation6 + $0x4d0] ss:$40 sps:$4 sm:$0xff]  }
 0x163   :  { %1382 = vmatpush1.bf16.msra.mxu1 %v3644_v9  ;;  %1425 = vmatpush1.bf16.msra.mxu0 %v3647_v10  ;;  %v3739_v9 = vld [vmem:[#allocation6 + $0x484] ss:$40 sps:$4 sm:$0xff]   ;;  %v3737_v10 = vld [vmem:[#allocation6 + $0x480] ss:$40 sps:$4 sm:$0xff]  }
 0x164   :  { %1383 = vmatprep.subr.bf16.mxu1 %v3652_v11  ;;  %1426 = vmatprep.subr.bf16.mxu0 %v3655_v12  ;;  %v3742_v11 = vld [vmem:[#allocation6 + $0x434] ss:$40 sps:$4 sm:$0xff]   ;;  %v3740_v12 = vld [vmem:[#allocation6 + $0x430] ss:$40 sps:$4 sm:$0xff]  }
 0x167   :  { %1384 = vmatpush1.bf16.msra.mxu1 %v3650_v13  ;;  %1427 = vmatpush1.bf16.msra.mxu0 %v3653_v14  ;;  %v3745_v13 = vld [vmem:[#allocation6 + $0x3e4] ss:$40 sps:$4 sm:$0xff]   ;;  %v3743_v14 = vld [vmem:[#allocation6 + $0x3e0] ss:$40 sps:$4 sm:$0xff]  }
 0x168   :  { %1385 = vmatprep.subr.bf16.mxu1 %v3658_v15  ;;  %1428 = vmatprep.subr.bf16.mxu0 %v3661_v16  ;;  %v3748_v15 = vld [vmem:[#allocation6 + $0x394] ss:$40 sps:$4 sm:$0xff]   ;;  %v3746_v16 = vld [vmem:[#allocation6 + $0x390] ss:$40 sps:$4 sm:$0xff]  }
 0x16b   :  { %1386 = vmatpush1.bf16.msra.mxu1 %v3656_v17  ;;  %1429 = vmatpush1.bf16.msra.mxu0 %v3659_v18  ;;  %v3751_v17 = vld [vmem:[#allocation6 + $0x344] ss:$40 sps:$4 sm:$0xff]   ;;  %v3749_v18 = vld [vmem:[#allocation6 + $0x340] ss:$40 sps:$4 sm:$0xff]  }
 0x16c   :  { %1387 = vmatprep.subr.bf16.mxu1 %v3664_v19  ;;  %1430 = vmatprep.subr.bf16.mxu0 %v3667_v20  ;;  %v3754_v19 = vld [vmem:[#allocation6 + $0x2f4] ss:$40 sps:$4 sm:$0xff]   ;;  %v3752_v20 = vld [vmem:[#allocation6 + $0x2f0] ss:$40 sps:$4 sm:$0xff]  }
 0x16f   :  { %1388 = vmatpush2.bf16.msra.mxu1 %v3662_v21  ;;  %1431 = vmatpush2.bf16.msra.mxu0 %v3665_v22  ;;  %v3757_v21 = vld [vmem:[#allocation6 + $0x2a4] ss:$40 sps:$4 sm:$0xff]   ;;  %v3755_v22 = vld [vmem:[#allocation6 + $0x2a0] ss:$40 sps:$4 sm:$0xff]  }
 0x170   :  { %1389 = vmatprep.subr.bf16.mxu1 %v3670_v23  ;;  %1432 = vmatprep.subr.bf16.mxu0 %v3673_v24  ;;  %v3758_v23 = vld [vmem:[#allocation6 + $0x730] ss:$40 sps:$4 sm:$0xff]   ;;  %v3760_v24 = vld [vmem:[#allocation6 + $0x734] ss:$40 sps:$4 sm:$0xff]  }
 0x173   :  { %1390 = vmatpush2.bf16.msra.mxu1 %v3668_v25  ;;  %1433 = vmatpush2.bf16.msra.mxu0 %v3671_v26  ;;  %v3761_v25 = vld [vmem:[#allocation6 + $0x738] ss:$40 sps:$4 sm:$0xff]   ;;  %v3763_v26 = vld [vmem:[#allocation6 + $0x73c] ss:$40 sps:$4 sm:$0xff]  }
 0x174   :  { %1391 = vmatprep.subr.bf16.mxu1 %v3676_v27  ;;  %1434 = vmatprep.subr.bf16.mxu0 %v3679_v28  ;;  %v3766_v27 = vld [vmem:[#allocation6 + $0x6e4] ss:$40 sps:$4 sm:$0xff]  }
 0x175   :  { %v3769_v28 = vld [vmem:[#allocation6 + $0x6ec] ss:$40 sps:$4 sm:$0xff]  }
 0x177   :  { %1392 = vmatpush2.bf16.msra.mxu1 %v3674_v29  ;;  %1435 = vmatpush2.bf16.msra.mxu0 %v3677_v30  ;;  %v3764_v29 = vld [vmem:[#allocation6 + $0x6e0] ss:$40 sps:$4 sm:$0xff]  }
 0x178   :  { %1393 = vmatprep.subr.bf16.mxu1 %v3682_v31  ;;  %1436 = vmatprep.subr.bf16.mxu0 %v3685_v32  ;;  %v3767_v30 = vld [vmem:[#allocation6 + $0x6e8] ss:$40 sps:$4 sm:$0xff]   ;;  %v3772_v31 = vld [vmem:[#allocation6 + $0x694] ss:$40 sps:$4 sm:$0xff]  }
 0x179   :  { %v3775_v32 = vld [vmem:[#allocation6 + $0x69c] ss:$40 sps:$4 sm:$0xff]  }
 0x17b   :  { %1394 = vmatpush2.bf16.msra.mxu1 %v3680_v36  ;;  %1437 = vmatpush2.bf16.msra.mxu0 %v3683_v37  ;;  %v3770_v36 = vld [vmem:[#allocation6 + $0x690] ss:$40 sps:$4 sm:$0xff]   ;;  %v3778_v37 = vld [vmem:[#allocation6 + $0x644] ss:$40 sps:$4 sm:$0xff]  }
 0x17c   :  { %1395 = vmatprep.subr.bf16.mxu1 %v3688_v38  ;;  %1438 = vmatprep.subr.bf16.mxu0 %v3691_v39  ;;  %v3781_v38 = vld [vmem:[#allocation6 + $0x64c] ss:$40 sps:$4 sm:$0xff]   ;;  %v3776_v39 = vld [vmem:[#allocation6 + $0x640] ss:$40 sps:$4 sm:$0xff]  }
 0x17f   :  { %1396 = vmatpush2.bf16.msra.mxu1 %v3686_v40  ;;  %1439 = vmatpush2.bf16.msra.mxu0 %v3689_v41  ;;  %v3779_v40 = vld [vmem:[#allocation6 + $0x648] ss:$40 sps:$4 sm:$0xff]   ;;  %v3784_v41 = vld [vmem:[#allocation6 + $0x5f4] ss:$40 sps:$4 sm:$0xff]  }
 0x180   :  { %1397 = vmatprep.subr.bf16.mxu1 %v3694_v42  ;;  %1440 = vmatprep.subr.bf16.mxu0 %v3697_v43  ;;  %v3787_v42 = vld [vmem:[#allocation6 + $0x5fc] ss:$40 sps:$4 sm:$0xff]   ;;  %v3782_v43 = vld [vmem:[#allocation6 + $0x5f0] ss:$40 sps:$4 sm:$0xff]  }
 0x183   :  { %1398 = vmatpush2.bf16.msra.mxu1 %v3692_v44  ;;  %1441 = vmatpush2.bf16.msra.mxu0 %v3695_v45  ;;  %v3785_v44 = vld [vmem:[#allocation6 + $0x5f8] ss:$40 sps:$4 sm:$0xff]   ;;  %v3790_v45 = vld [vmem:[#allocation6 + $0x5a4] ss:$40 sps:$4 sm:$0xff]  }
 0x184   :  { %1399 = vmatprep.subr.bf16.mxu1 %v3700_v46  ;;  %1442 = vmatprep.subr.bf16.mxu0 %v3703_v47  ;;  %v3793_v46 = vld [vmem:[#allocation6 + $0x5ac] ss:$40 sps:$4 sm:$0xff]   ;;  %v3788_v47 = vld [vmem:[#allocation6 + $0x5a0] ss:$40 sps:$4 sm:$0xff]  }
 0x187   :  { %1400 = vmatpush2.bf16.msra.mxu1 %v3698_v48  ;;  %1443 = vmatpush2.bf16.msra.mxu0 %v3701_v49  ;;  %v3791_v48 = vld [vmem:[#allocation6 + $0x5a8] ss:$40 sps:$4 sm:$0xff]   ;;  %v3796_v49 = vld [vmem:[#allocation6 + $0x554] ss:$40 sps:$4 sm:$0xff]  }
 0x188   :  { %1401 = vmatprep.subr.bf16.mxu1 %v3706_v50  ;;  %1444 = vmatprep.subr.bf16.mxu0 %v3709_v52  ;;  %v3799_v50 = vld [vmem:[#allocation6 + $0x55c] ss:$40 sps:$4 sm:$0xff]   ;;  %v3794_v52 = vld [vmem:[#allocation6 + $0x550] ss:$40 sps:$4 sm:$0xff]  }
 0x18b   :  { %1402 = vmatpush2.bf16.msra.mxu1 %v3704_v53  ;;  %1445 = vmatpush2.bf16.msra.mxu0 %v3707_v55  ;;  %v3797_v53 = vld [vmem:[#allocation6 + $0x558] ss:$40 sps:$4 sm:$0xff]   ;;  %v3802_v55 = vld [vmem:[#allocation6 + $0x504] ss:$40 sps:$4 sm:$0xff]  }
 0x18c   :  { %1457 = vmatprep.subr.bf16.mxu1 %v3712_v56  ;;  %2583 = vmatprep.subr.bf16.mxu0 %v3760_v24  ;;  %v3805_v56 = vld [vmem:[#allocation6 + $0x50c] ss:$40 sps:$4 sm:$0xff]   ;;  %v3848_v24 = vld [vmem:[#allocation6 + $0x780] ss:$40 sps:$4 sm:$0xff]  }
 0x18e   :  { %1404 = vmatmul.mubr.bf16.vlgmr.msra.gmra.mxu1 %v4244_v54  ;;  %1447 = vmatmul.mubr.bf16.vlgmr.msra.gmra.mxu0 %v4244_v54 }
 0x18f   :  { %1458 = vmatpush1.bf16.msra.mxu1 %v3710_v57  ;;  %1489 = vmatprep.mubr.bf16.mxu1 %v4242_v51  ;;  %v3728_v51 = vld [vmem:[#allocation6 + $0x70] ss:$40 sps:$4 sm:$0xff]   ;;  %v3800_v57 = vld [vmem:[#allocation6 + $0x500] ss:$40 sps:$4 sm:$0xff]  }
 0x190   :  { %1459 = vmatprep.subr.bf16.mxu1 %v3715_v58  ;;  %2584 = vmatpush1.bf16.msra.mxu0 %v3758_v23  ;;  %v3803_v58 = vld [vmem:[#allocation6 + $0x508] ss:$40 sps:$4 sm:$0xff]   ;;  %v3853_v23 = vld [vmem:[#allocation6 + $0x78c] ss:$40 sps:$4 sm:$0xff]  }
 0x191   :  { %2585 = vmatprep.subr.bf16.mxu0 %v3766_v27  ;;  %v3859_v27 = vld [vmem:[#allocation6 + $0x74c] ss:$40 sps:$4 sm:$0xff]  }
 0x193   :  { %1460 = vmatpush1.bf16.msra.mxu1 %v3713_v59  ;;  %v3808_v59 = vld [vmem:[#allocation6 + $0x9b4] ss:$40 sps:$4 sm:$0xff]  }
 0x194   :  { %1461 = vmatprep.subr.bf16.mxu1 %v3718_v60  ;;  %2586 = vmatpush1.bf16.msra.mxu0 %v3764_v29  ;;  %v3811_v60 = vld [vmem:[#allocation6 + $0x9bc] ss:$40 sps:$4 sm:$0xff]  }
 0x195   :  { %2587 = vmatprep.subr.bf16.mxu0 %v3772_v31 }
 0x197   :  { %1462 = vmatpush1.bf16.msra.mxu1 %v3716_v61  ;;  %v3806_v61 = vld [vmem:[#allocation6 + $0x9b0] ss:$40 sps:$4 sm:$0xff]  }
 0x198   :  { %1463 = vmatprep.subr.bf16.mxu1 %v3721_v62  ;;  %2588 = vmatpush1.bf16.msra.mxu0 %v3770_v36  ;;  %v3809_v62 = vld [vmem:[#allocation6 + $0x9b8] ss:$40 sps:$4 sm:$0xff]  }
 0x199   :  { %2589 = vmatprep.subr.bf16.mxu0 %v3778_v37  ;;  %v107_v37 = vadd.s32 8, %v4232_v33 }
 0x19b   :  { %1464 = vmatpush1.bf16.msra.mxu1 %v3719_v63  ;;  %v3814_v63 = vld [vmem:[#allocation6 + $0x964] ss:$40 sps:$4 sm:$0xff]  }
 0x19c   :  { %1465 = vmatprep.subr.bf16.mxu1 %v3724_v0  ;;  %2590 = vmatpush1.bf16.msra.mxu0 %v3776_v39  ;;  %v3817_v0 = vld [vmem:[#allocation6 + $0x96c] ss:$40 sps:$4 sm:$0xff]  }
 0x19d   :  { %2591 = vmatprep.subr.bf16.mxu0 %v3784_v41  ;;  %v109_v41 = vand.u32 7, %v107_v37 }
 0x19f   :  { %1466 = vmatpush1.bf16.msra.mxu1 %v3722_v1  ;;  %v3812_v1 = vld [vmem:[#allocation6 + $0x960] ss:$40 sps:$4 sm:$0xff]  }
 0x1a0   :  { %1467 = vmatprep.subr.bf16.mxu1 %v3727_v2  ;;  %2592 = vmatpush1.bf16.msra.mxu0 %v3782_v43  ;;  %v3815_v2 = vld [vmem:[#allocation6 + $0x968] ss:$40 sps:$4 sm:$0xff]  }
 0x1a1   :  { %2593 = vmatprep.subr.bf16.mxu0 %v3790_v45 }
 0x1a3   :  { %1468 = vmatpush1.bf16.msra.mxu1 %v3725_v3  ;;  %v3820_v3 = vld [vmem:[#allocation6 + $0x914] ss:$40 sps:$4 sm:$0xff]  }
 0x1a4   :  { %1469 = vmatprep.subr.bf16.mxu1 %v3730_v4  ;;  %2594 = vmatpush1.bf16.msra.mxu0 %v3788_v47  ;;  %v3823_v4 = vld [vmem:[#allocation6 + $0x91c] ss:$40 sps:$4 sm:$0xff]  }
 0x1a5   :  { %2595 = vmatprep.subr.bf16.mxu0 %v3796_v49 }
 0x1a7   :  { %1470 = vmatpush1.bf16.msra.mxu1 %v3728_v51  ;;  %v3818_v51 = vld [vmem:[#allocation6 + $0x910] ss:$40 sps:$4 sm:$0xff]  }
 0x1a8   :  { %1471 = vmatprep.subr.bf16.mxu1 %v3733_v5  ;;  %2596 = vmatpush1.bf16.msra.mxu0 %v3794_v52  ;;  %v3821_v5 = vld [vmem:[#allocation6 + $0x918] ss:$40 sps:$4 sm:$0xff]  }
 0x1a9   :  { %2597 = vmatprep.subr.bf16.mxu0 %v3802_v55 }
 0x1ab   :  { %1472 = vmatpush1.bf16.msra.mxu1 %v3731_v6  ;;  %v3826_v6 = vld [vmem:[#allocation6 + $0x8c4] ss:$40 sps:$4 sm:$0xff]  }
 0x1ac   :  { %1473 = vmatprep.subr.bf16.mxu1 %v3736_v7  ;;  %2598 = vmatpush1.bf16.msra.mxu0 %v3800_v57  ;;  %v3829_v7 = vld [vmem:[#allocation6 + $0x8cc] ss:$40 sps:$4 sm:$0xff]  }
 0x1ad   :  { %2599 = vmatprep.subr.bf16.mxu0 %v3808_v59 }
 0x1af   :  { %1474 = vmatpush2.bf16.msra.mxu1 %v3734_v8  ;;  %v3824_v8 = vld [vmem:[#allocation6 + $0x8c0] ss:$40 sps:$4 sm:$0xff]  }
 0x1b0   :  { %1475 = vmatprep.subr.bf16.mxu1 %v3739_v9  ;;  %2600 = vmatpush2.bf16.msra.mxu0 %v3806_v61  ;;  %v3827_v9 = vld [vmem:[#allocation6 + $0x8c8] ss:$40 sps:$4 sm:$0xff]  }
 0x1b1   :  { %2601 = vmatprep.subr.bf16.mxu0 %v3814_v63 }
 0x1b3   :  { %1476 = vmatpush2.bf16.msra.mxu1 %v3737_v10  ;;  %v3832_v10 = vld [vmem:[#allocation6 + $0x874] ss:$40 sps:$4 sm:$0xff]  }
 0x1b4   :  { %1477 = vmatprep.subr.bf16.mxu1 %v3742_v11  ;;  %2602 = vmatpush2.bf16.msra.mxu0 %v3812_v1  ;;  %v3835_v11 = vld [vmem:[#allocation6 + $0x87c] ss:$40 sps:$4 sm:$0xff]  }
 0x1b5   :  { %2603 = vmatprep.subr.bf16.mxu0 %v3820_v3 }
 0x1b7   :  { %1478 = vmatpush2.bf16.msra.mxu1 %v3740_v12  ;;  %v3830_v12 = vld [vmem:[#allocation6 + $0x870] ss:$40 sps:$4 sm:$0xff]  }
 0x1b8   :  { %1479 = vmatprep.subr.bf16.mxu1 %v3745_v13  ;;  %2604 = vmatpush2.bf16.msra.mxu0 %v3818_v51  ;;  %v3833_v13 = vld [vmem:[#allocation6 + $0x878] ss:$40 sps:$4 sm:$0xff]  }
 0x1b9   :  { %2605 = vmatprep.subr.bf16.mxu0 %v3826_v6 }
 0x1bb   :  { %1480 = vmatpush2.bf16.msra.mxu1 %v3743_v14  ;;  %v3838_v14 = vld [vmem:[#allocation6 + $0x824] ss:$40 sps:$4 sm:$0xff]  }
 0x1bc   :  { %1481 = vmatprep.subr.bf16.mxu1 %v3748_v15  ;;  %2606 = vmatpush2.bf16.msra.mxu0 %v3824_v8  ;;  %v3841_v15 = vld [vmem:[#allocation6 + $0x82c] ss:$40 sps:$4 sm:$0xff]  }
 0x1bd   :  { %2607 = vmatprep.subr.bf16.mxu0 %v3832_v10 }
 0x1bf   :  { %1482 = vmatpush2.bf16.msra.mxu1 %v3746_v16  ;;  %v3836_v16 = vld [vmem:[#allocation6 + $0x820] ss:$40 sps:$4 sm:$0xff]  }
 0x1c0   :  { %1483 = vmatprep.subr.bf16.mxu1 %v3751_v17  ;;  %2608 = vmatpush2.bf16.msra.mxu0 %v3830_v12  ;;  %v3839_v17 = vld [vmem:[#allocation6 + $0x828] ss:$40 sps:$4 sm:$0xff]  }
 0x1c1   :  { %2609 = vmatprep.subr.bf16.mxu0 %v3838_v14 }
 0x1c3   :  { %1484 = vmatpush2.bf16.msra.mxu1 %v3749_v18  ;;  %v3844_v18 = vld [vmem:[#allocation6 + $0x7d4] ss:$40 sps:$4 sm:$0xff]  }
 0x1c4   :  { %1485 = vmatprep.subr.bf16.mxu1 %v3754_v19  ;;  %2610 = vmatpush2.bf16.msra.mxu0 %v3836_v16  ;;  %v3842_v19 = vld [vmem:[#allocation6 + $0x7d0] ss:$40 sps:$4 sm:$0xff]  }
 0x1c5   :  { %2611 = vmatprep.subr.bf16.mxu0 %v3844_v18  ;;  %v4313_v18 = vadd.s32 2, %v109_v41 }
 0x1c7   :  { %1486 = vmatpush2.bf16.msra.mxu1 %v3752_v20  ;;  %v3845_v20 = vld [vmem:[#allocation6 + $0x7d8] ss:$40 sps:$4 sm:$0xff]   ;;  %vm1589_vm12 = vcmp.lt.s32.totalorder %v4313_v18, 8  ;;  %v3429_v18 = vld [vmem:[#allocation10] ss:$0 sm:$0xff] }
 0x1c8   :  { %1487 = vmatprep.subr.bf16.mxu1 %v3757_v21  ;;  %v3847_v21 = vld [vmem:[#allocation6 + $0x7dc] ss:$40 sps:$4 sm:$0xff]   ;;  %2612 = vmatpush2.bf16.msra.mxu0 %v3842_v19 }
 0x1cb   :  { %1488 = vmatpush2.bf16.msra.mxu1 %v3755_v22  ;;  %v3850_v22 = vld [vmem:[#allocation6 + $0x784] ss:$40 sps:$4 sm:$0xff]  }
 0x1cc   :  { %2626 = vmatprep.subr.bf16.mxu1 %v3763_v26  ;;  %2613 = vmatprep.subr.bf16.mxu0 %v3850_v22  ;;  %v3856_v26 = vld [vmem:[#allocation6 + $0x744] ss:$40 sps:$4 sm:$0xff]  }
 0x1cd   :  { %2614 = vmatpush2.bf16.msra.mxu0 %v3848_v24 }
 0x1ce   :  { %1490 = vmatmul.mubr.bf16.vlgmr.msra.gmra.mxu1 %v4244_v54  ;;  %v3773_v54 = vld [vmem:[#allocation6 + $0x698] ss:$40 sps:$4 sm:$0xff]   ;;  %2669 = vmatprep.subr.bf16.mxu0 %v3856_v26 }
 0x1cf   :  { %2627 = vmatpush1.bf16.msra.mxu1 %v3761_v25  ;;  %v3851_v25 = vld [vmem:[#allocation6 + $0x788] ss:$40 sps:$4 sm:$0xff]  }
 0x1d0   :  { %2628 = vmatprep.subr.bf16.mxu1 %v3769_v28 }
 0x1d3   :  { %2629 = vmatpush1.bf16.msra.mxu1 %v3767_v30 }
 0x1d4   :  { %2630 = vmatprep.subr.bf16.mxu1 %v3775_v32 }
 0x1d7   :  { %2631 = vmatpush1.bf16.msra.mxu1 %v3773_v54 }
 0x1d8   :  { %2632 = vmatprep.subr.bf16.mxu1 %v3781_v38 }
 0x1db   :  { %2633 = vmatpush1.bf16.msra.mxu1 %v3779_v40  ;;  %v108_v40 = vand.u32 7, %v4232_v33 }
 0x1dc   :  { %2634 = vmatprep.subr.bf16.mxu1 %v3787_v42 }
 0x1dd   :  { %v4262_v45 = vadd.s32 4294967295, %v108_v40  ;;  %v4294_v6 = vadd.s32 2, %v108_v40 }
 0x1df   :  { %2635 = vmatpush1.bf16.msra.mxu1 %v3785_v44  ;;  %v4260_v44 = vadd.s32 4294967294, %v108_v40  ;;  %vm1532_vm4 = vcmp.ge.s32.totalorder %v4262_v45, 0  ;;  %vm1588_vm11 = vcmp.lt.s32.totalorder %v4294_v6, 8 }
 0x1e0   :  { %2636 = vmatprep.subr.bf16.mxu1 %v3793_v46  ;;  %v4264_v46 = vadd.s32 4294967294, %v109_v41 }
 0x1e1   :  { %vm1511_vm3 = vcmp.ge.s32.totalorder %v4260_v44, 0 }
 0x1e2   :  { %vm1512_vm5 = vcmp.ge.s32.totalorder %v4264_v46, 0 }
 0x1e3   :  { %2637 = vmatpush1.bf16.msra.mxu1 %v3791_v48 }
 0x1e4   :  { %2638 = vmatprep.subr.bf16.mxu1 %v3799_v50 }
 0x1e7   :  { %2639 = vmatpush1.bf16.msra.mxu1 %v3797_v53  ;;  %v4270_v53 = vadd.s32 4294967295, %v109_v41 }
 0x1e8   :  { %2640 = vmatprep.subr.bf16.mxu1 %v3805_v56  ;;  %v4272_v56 = vadd.s32 1, %v108_v40 }
 0x1e9   :  { %vm1533_vm6 = vcmp.ge.s32.totalorder %v4270_v53, 0 }
 0x1ea   :  { %vm1563_vm8 = vcmp.lt.s32.totalorder %v4272_v56, 8 }
 0x1eb   :  { %2641 = vmatpush1.bf16.msra.mxu1 %v3803_v58 }
 0x1ec   :  { %2642 = vmatprep.subr.bf16.mxu1 %v3811_v60 }
 0x1ef   :  { %2643 = vmatpush2.bf16.msra.mxu1 %v3809_v62 }
 0x1f0   :  { %2644 = vmatprep.subr.bf16.mxu1 %v3817_v0 }
 0x1f3   :  { %2645 = vmatpush2.bf16.msra.mxu1 %v3815_v2  ;;  %v4287_v2 = vadd.s32 1, %v109_v41 }
 0x1f4   :  { %2646 = vmatprep.subr.bf16.mxu1 %v3823_v4 }
 0x1f5   :  { %vm1564_vm9 = vcmp.lt.s32.totalorder %v4287_v2, 8 }
 0x1f7   :  { %2647 = vmatpush2.bf16.msra.mxu1 %v3821_v5 }
 0x1f8   :  { %2648 = vmatprep.subr.bf16.mxu1 %v3829_v7 }
 0x1fb   :  { %2649 = vmatpush2.bf16.msra.mxu1 %v3827_v9 }
 0x1fc   :  { %2650 = vmatprep.subr.bf16.mxu1 %v3835_v11 }
 0x1ff   :  { %2651 = vmatpush2.bf16.msra.mxu1 %v3833_v13 }
 0x200   :  { %2652 = vmatprep.subr.bf16.mxu1 %v3841_v15 }
 0x203   :  { %2653 = vmatpush2.bf16.msra.mxu1 %v3839_v17 }
 0x204   :  { %2654 = vmatprep.subr.bf16.mxu1 %v3847_v21 }
 0x207   :  { %2655 = vmatpush2.bf16.msra.mxu1 %v3845_v20 }
 0x208   :  { %2656 = vmatprep.subr.bf16.mxu1 %v3853_v23  ;;  %v1600_v23 = vld [vmem:[#allocation7] sm:$0x3] }
 0x209   :  { %v1609_v41 = vrot.slane %v1600_v23, %v4235_v34 }
 0x20b   :  { %2657 = vmatpush2.bf16.msra.mxu1 %v3851_v25 }
 0x20c   :  { %2712 = vmatprep.subr.bf16.mxu1 %v3859_v27 }
 0x20e   :  { %v1362_v28 = vpop.f32.mrf.mxu0  ;;  %v1319_v29 = vpop.f32.mrf.mxu1 }
 0x20f   :  { %v1500_v57 = vrot.slane %v1319_v29, 6  ;;  %v1521_v58 = vrot.slane %v1362_v28, 7 }
 0x210   :  { %v1364_v30 = vpop.f32.mrf.mxu0  ;;  %v1321_v31 = vpop.f32.mrf.mxu1 }
 0x211   :  { %v1501_v59 = vrot.slane %v1321_v31, 6  ;;  %v1522_v60 = vrot.slane %v1364_v30, 7 }
 0x212   :  { %v1366_v32 = vpop.f32.mrf.mxu0  ;;  %v1323_v36 = vpop.f32.mrf.mxu1 }
 0x213   :  { %v1502_v47 = vrot.slane %v1323_v36, 6  ;;  %v1523_v48 = vrot.slane %v1366_v32, 7 }
 0x214   :  { %v1368_v54 = vpop.f32.mrf.mxu0  ;;  %v1325_v39 = vpop.f32.mrf.mxu1 }
 0x215   :  { %v1503_v49 = vrot.slane %v1325_v39, 6  ;;  %v1524_v50 = vrot.slane %v1368_v54, 7  ;;  %v1507_v61 = vsel %vm1504_vm1, %v1502_v47, %v1500_v57  ;;  %v1528_v62 = vsel %vm1525_vm2, %v1523_v48, %v1521_v58 }
 0x216   :  { %v1505_v4 = vsel %vm1504_vm1, %v1500_v57, %v1502_v47  ;;  %v1526_v51 = vsel %vm1525_vm2, %v1521_v58, %v1523_v48  ;;  %v1517_v7 = vsel %vm1511_vm3, %v1507_v61, 0.0  ;;  %v1538_v8 = vsel %vm1532_vm4, %v1528_v62, 0.0 }
 0x217   :  { %v1508_v63 = vsel %vm1504_vm1, %v1503_v49, %v1501_v59  ;;  %v1529_v0 = vsel %vm1525_vm2, %v1524_v50, %v1522_v60  ;;  %v1506_v13 = vsel %vm1504_vm1, %v1501_v59, %v1503_v49  ;;  %v1527_v14 = vsel %vm1525_vm2, %v1522_v60, %v1524_v50 }
 0x218   :  { %v1518_v9 = vsel %vm1511_vm3, %v1508_v63, 0.0  ;;  %v1539_v10 = vsel %vm1532_vm4, %v1529_v0, 0.0  ;;  %v1519_v16 = vsel %vm1512_vm5, %v1505_v4, 0.0  ;;  %v1540_v17 = vsel %vm1533_vm6, %v1526_v51, 0.0 }
 0x219   :  { %v1542_v24 = vadd.f32 %v1538_v8, %v1517_v7  ;;  %v1543_v25 = vadd.f32 %v1539_v10, %v1518_v9  ;;  %v1520_v26 = vsel %vm1512_vm5, %v1506_v13, 0.0  ;;  %v1541_v27 = vsel %vm1533_vm6, %v1527_v14, 0.0 }
 0x21a   :  { %v1544_v28 = vadd.f32 %v1540_v17, %v1519_v16  ;;  %v1605_v54 = vrot.slane %v1600_v23, %v4238_v35  ;;  %v1545_v39 = vadd.f32 %v1541_v27, %v1520_v26  ;;  %v3860_v26 = vld [vmem:[#allocation6 + $0x6f0] ss:$40 sps:$4 sm:$0xff]  }
 0x21b   :  { %v3863_v27 = vld [vmem:[#allocation6 + $0x6f8] ss:$40 sps:$4 sm:$0xff]  }
 0x24e   :  { %v1448_v38 = vpop.f32.mrf.mxu0  ;;  %v4258_v42 = vpop.f32.mrf.mxu1 }
 0x24f   :  { %v1550_v11 = vrot.slane %v1448_v38, 1  ;;  %v1546_v37 = vadd.f32 %v1542_v24, %v4258_v42  ;;  %v3862_v24 = vld [vmem:[#allocation6 + $0x6f4] ss:$40 sps:$4 sm:$0xff]  }
 0x250   :  { %v1450_v43 = vpop.f32.mrf.mxu0  ;;  %v4266_v52 = vpop.f32.mrf.mxu1 }
 0x251   :  { %v1551_v19 = vrot.slane %v1450_v43, 1  ;;  %v1547_v50 = vadd.f32 %v1543_v25, %v4266_v52  ;;  %v3865_v25 = vld [vmem:[#allocation6 + $0x6fc] ss:$40 sps:$4 sm:$0xff]  }
 0x252   :  { %v1452_v55 = vpop.f32.mrf.mxu0  ;;  %v1409_v1 = vpop.f32.mrf.mxu1 }
 0x253   :  { %v1552_v5 = vrot.slane %v1452_v55, 1  ;;  %v1548_v38 = vadd.f32 %v1544_v28, %v1409_v1  ;;  %v3868_v28 = vld [vmem:[#allocation6 + $0x6a4] ss:$40 sps:$4 sm:$0xff]  }
 0x254   :  { %v1454_v3 = vpop.f32.mrf.mxu0  ;;  %v1411_v12 = vpop.f32.mrf.mxu1 }
 0x255   :  { %v1553_v15 = vrot.slane %v1454_v3, 1  ;;  %v1555_v20 = vsel %vm1554_vm7, %v1550_v11, %v1552_v5  ;;  %v1557_v21 = vsel %vm1554_vm7, %v1552_v5, %v1550_v11  ;;  %v1549_v58 = vadd.f32 %v1545_v39, %v1411_v12  ;;  %v3883_v39 = vld [vmem:[#allocation6 + $0x60c] ss:$40 sps:$4 sm:$0xff]  }
 0x256   :  { %v1567_v32 = vsel %vm1563_vm8, %v1555_v20, 0.0  ;;  %v1569_v36 = vsel %vm1564_vm9, %v1557_v21, 0.0  ;;  %v3854_v21 = vld [vmem:[#allocation6 + $0x740] ss:$40 sps:$4 sm:$0xff]  }
 0x257   :  { %v1556_v29 = vsel %vm1554_vm7, %v1551_v19, %v1553_v15  ;;  %v1558_v30 = vsel %vm1554_vm7, %v1553_v15, %v1551_v19  ;;  %v1571_v55 = vadd.f32 %v1567_v32, %v1546_v37  ;;  %v1573_v57 = vadd.f32 %v1569_v36, %v1548_v38  ;;  %v3874_v32 = vld [vmem:[#allocation6 + $0x654] ss:$40 sps:$4 sm:$0xff]   ;;  %v3875_v37 = vld [vmem:[#allocation6 + $0x658] ss:$40 sps:$4 sm:$0xff]   ;;  %v3880_v38 = vld [vmem:[#allocation6 + $0x604] ss:$40 sps:$4 sm:$0xff]  }
 0x258   :  { %v1568_v43 = vsel %vm1563_vm8, %v1556_v29, 0.0  ;;  %v1570_v47 = vsel %vm1564_vm9, %v1558_v30, 0.0  ;;  %v3871_v29 = vld [vmem:[#allocation6 + $0x6ac] ss:$40 sps:$4 sm:$0xff]   ;;  %v3866_v30 = vld [vmem:[#allocation6 + $0x6a0] ss:$40 sps:$4 sm:$0xff]  }
 0x259   :  { %v1572_v63 = vadd.f32 %v1568_v43, %v1547_v50  ;;  %v1574_v0 = vadd.f32 %v1570_v47, %v1549_v58  ;;  %v3877_v36 = vld [vmem:[#allocation6 + $0x65c] ss:$40 sps:$4 sm:$0xff]   ;;  %v3893_v58 = vld [vmem:[#allocation6 + $0x568] ss:$40 sps:$4 sm:$0xff]  }
 0x25a   :  { %v3886_v43 = vld [vmem:[#allocation6 + $0x5b4] ss:$40 sps:$4 sm:$0xff]   ;;  %v3892_v50 = vld [vmem:[#allocation6 + $0x564] ss:$40 sps:$4 sm:$0xff]  }
 0x25b   :  { %v3889_v47 = vld [vmem:[#allocation6 + $0x5bc] ss:$40 sps:$4 sm:$0xff]  }
 0x28e   :  { %v1491_v22 = vpop.f32.mrf.mxu1 }
 0x28f   :  { %v1575_v48 = vrot.slane %v1491_v22, 2  ;;  %v3857_v22 = vld [vmem:[#allocation6 + $0x748] ss:$40 sps:$4 sm:$0xff]  }
 0x290   :  { %v1493_v31 = vpop.f32.mrf.mxu1 }
 0x291   :  { %v1576_v42 = vrot.slane %v1493_v31, 2  ;;  %v3869_v31 = vld [vmem:[#allocation6 + $0x6a8] ss:$40 sps:$4 sm:$0xff]  }
 0x292   :  { %v1495_v40 = vpop.f32.mrf.mxu1 }
 0x293   :  { %v1577_v49 = vrot.slane %v1495_v40, 2  ;;  %v3878_v40 = vld [vmem:[#allocation6 + $0x600] ss:$40 sps:$4 sm:$0xff]  }
 0x294   :  { %v1497_v59 = vpop.f32.mrf.mxu1 }
 0x295   :  { %v1580_v60 = vsel %vm1579_vm10, %v1575_v48, %v1577_v49  ;;  %v1582_v61 = vsel %vm1579_vm10, %v1577_v49, %v1575_v48  ;;  %v1578_v62 = vrot.slane %v1497_v59, 2  ;;  %v3884_v48 = vld [vmem:[#allocation6 + $0x5b0] ss:$40 sps:$4 sm:$0xff]   ;;  %v3898_v59 = vld [vmem:[#allocation6 + $0x514] ss:$40 sps:$4 sm:$0xff]  }
 0x296   :  { %v1592_v1 = vsel %vm1588_vm11, %v1580_v60, 0.0  ;;  %v1594_v52 = vsel %vm1589_vm12, %v1582_v61, 0.0  ;;  %v3887_v49 = vld [vmem:[#allocation6 + $0x5b8] ss:$40 sps:$4 sm:$0xff]  }
 0x297   :  { %v1596_v3 = vadd.f32 %v1592_v1, %v1571_v55  ;;  %v1598_v4 = vadd.f32 %v1594_v52, %v1573_v57  ;;  %v1581_v51 = vsel %vm1579_vm10, %v1576_v42, %v1578_v62  ;;  %v1583_v5 = vsel %vm1579_vm10, %v1578_v62, %v1576_v42  ;;  %v3895_v55 = vld [vmem:[#allocation6 + $0x56c] ss:$40 sps:$4 sm:$0xff]   ;;  %v3890_v57 = vld [vmem:[#allocation6 + $0x560] ss:$40 sps:$4 sm:$0xff]   ;;  %v3901_v42 = vld [vmem:[#allocation6 + $0x51c] ss:$40 sps:$4 sm:$0xff]  }
 0x298   :  { %v1593_v7 = vsel %vm1588_vm11, %v1581_v51, 0.0  ;;  %v1595_v8 = vsel %vm1589_vm12, %v1583_v5, 0.0  ;;  %v3896_v60 = vld [vmem:[#allocation6 + $0x510] ss:$40 sps:$4 sm:$0xff]   ;;  %v3904_v62 = vld [vmem:[#allocation6 + $0x9c4] ss:$40 sps:$4 sm:$0xff]  }
 0x299   :  { %v1612_v9 = vadd.f32 %v1605_v54, %v1596_v3  ;;  %v1614_v10 = vadd.f32 %v1605_v54, %v1598_v4  ;;  %v1597_v11 = vadd.f32 %v1593_v7, %v1572_v63  ;;  %v1599_v12 = vadd.f32 %v1595_v8, %v1574_v0  ;;  %v3872_v54 = vld [vmem:[#allocation6 + $0x650] ss:$40 sps:$4 sm:$0xff]   ;;  %v3907_v63 = vld [vmem:[#allocation6 + $0x9cc] ss:$40 sps:$4 sm:$0xff]   ;;  %v3902_v0 = vld [vmem:[#allocation6 + $0x9c0] ss:$40 sps:$4 sm:$0xff]  }
 0x29a   :  { %v3899_v61 = vld [vmem:[#allocation6 + $0x518] ss:$40 sps:$4 sm:$0xff]   ;;  %v3905_v1 = vld [vmem:[#allocation6 + $0x9c8] ss:$40 sps:$4 sm:$0xff]   ;;  %v3910_v52 = vld [vmem:[#allocation6 + $0x974] ss:$40 sps:$4 sm:$0xff]  }
 0x29b   :  { %v1613_v13 = vadd.f32 %v1609_v41, %v1597_v11  ;;  %v1615_v14 = vadd.f32 %v1609_v41, %v1599_v12  ;;  %v1616_v15 = vmax.f32 %v1612_v9, 0.0  ;;  %v1618_v16 = vmax.f32 %v1614_v10, 0.0  ;;  %v3881_v41 = vld [vmem:[#allocation6 + $0x608] ss:$40 sps:$4 sm:$0xff]   ;;  %v3913_v3 = vld [vmem:[#allocation6 + $0x97c] ss:$40 sps:$4 sm:$0xff]  }
 0x29c   :  { %v3908_v4 = vld [vmem:[#allocation6 + $0x970] ss:$40 sps:$4 sm:$0xff]   ;;  %v3916_v5 = vld [vmem:[#allocation6 + $0x924] ss:$40 sps:$4 sm:$0xff]   ;;  %v3914_v8 = vld [vmem:[#allocation6 + $0x920] ss:$40 sps:$4 sm:$0xff]  }
 0x29d   :  { %v1617_v17 = vmax.f32 %v1613_v13, 0.0  ;;  %v1619_v19 = vmax.f32 %v1615_v14, 0.0  ;;  %v4360_v23 = vpack.c.bf16 %v1618_v16, %v1616_v15  ;;  %v3911_v51 = vld [vmem:[#allocation6 + $0x978] ss:$40 sps:$4 sm:$0xff]   ;;  %v3919_v7 = vld [vmem:[#allocation6 + $0x92c] ss:$40 sps:$4 sm:$0xff]  }
 0x29e   :  { %v3917_v9 = vld [vmem:[#allocation6 + $0x928] ss:$40 sps:$4 sm:$0xff]   ;;  %v3922_v10 = vld [vmem:[#allocation6 + $0x8d4] ss:$40 sps:$4 sm:$0xff]   ;;  %v3923_v13 = vld [vmem:[#allocation6 + $0x8d8] ss:$40 sps:$4 sm:$0xff]  }
 0x29f   :  { %v4358_v20 = vpack.c.bf16 %v1619_v19, %v1617_v17  ;;  %v3925_v11 = vld [vmem:[#allocation6 + $0x8dc] ss:$40 sps:$4 sm:$0xff]   ;;  %v3920_v12 = vld [vmem:[#allocation6 + $0x8d0] ss:$40 sps:$4 sm:$0xff]   ;;  %v3931_v15 = vld [vmem:[#allocation6 + $0x88c] ss:$40 sps:$4 sm:$0xff]  }
 0x2a0   :  { %v3928_v14 = vld [vmem:[#allocation6 + $0x884] ss:$40 sps:$4 sm:$0xff]   ;;  %v3926_v16 = vld [vmem:[#allocation6 + $0x880] ss:$40 sps:$4 sm:$0xff]   ;;  %v3934_v19 = vld [vmem:[#allocation6 + $0x834] ss:$40 sps:$4 sm:$0xff]  }
 0x2a1   :  { %2615 = vmatprep.mubr.bf16.mxu0 %v4358_v20  ;;  %2658 = vmatprep.mubr.bf16.mxu1 %v4358_v20  ;;  %v3929_v17 = vld [vmem:[#allocation6 + $0x888] ss:$40 sps:$4 sm:$0xff]  }
 0x2a2   :  { %2616 = vmatmul.mubr.bf16.vlgmr.msra.gmra.mxu0 %v4360_v23  ;;  %2659 = vmatmul.mubr.bf16.vlgmr.msra.gmra.mxu1 %v4360_v23 }
 0x2a3   :  { %2670 = vmatpush1.bf16.msra.mxu0 %v3854_v21  ;;  %2713 = vmatpush1.bf16.msra.mxu1 %v3857_v22  ;;  %v3937_v21 = vld [vmem:[#allocation6 + $0x83c] ss:$40 sps:$4 sm:$0xff]   ;;  %v3932_v22 = vld [vmem:[#allocation6 + $0x830] ss:$40 sps:$4 sm:$0xff]  }
 0x2a4   :  { %2701 = vmatprep.mubr.bf16.mxu0 %v4358_v20  ;;  %2744 = vmatprep.mubr.bf16.mxu1 %v4358_v20 }
 0x2a5   :  { %2671 = vmatprep.subr.bf16.mxu0 %v3862_v24  ;;  %2714 = vmatprep.subr.bf16.mxu1 %v3865_v25  ;;  %v3935_v24 = vld [vmem:[#allocation6 + $0x838] ss:$40 sps:$4 sm:$0xff]   ;;  %v3940_v25 = vld [vmem:[#allocation6 + $0x7e4] ss:$40 sps:$4 sm:$0xff]  }
 0x2a7   :  { %2672 = vmatpush1.bf16.msra.mxu0 %v3860_v26  ;;  %2715 = vmatpush1.bf16.msra.mxu1 %v3863_v27  ;;  %v3943_v26 = vld [vmem:[#allocation6 + $0x7ec] ss:$40 sps:$4 sm:$0xff]   ;;  %v3938_v27 = vld [vmem:[#allocation6 + $0x7e0] ss:$40 sps:$4 sm:$0xff]  }
 0x2a8   :  { %2673 = vmatprep.subr.bf16.mxu0 %v3868_v28  ;;  %2716 = vmatprep.subr.bf16.mxu1 %v3871_v29  ;;  %v3941_v28 = vld [vmem:[#allocation6 + $0x7e8] ss:$40 sps:$4 sm:$0xff]   ;;  %v3946_v29 = vld [vmem:[#allocation6 + $0x794] ss:$40 sps:$4 sm:$0xff]  }
 0x2ab   :  { %2674 = vmatpush1.bf16.msra.mxu0 %v3866_v30  ;;  %2717 = vmatpush1.bf16.msra.mxu1 %v3869_v31  ;;  %v3949_v30 = vld [vmem:[#allocation6 + $0x79c] ss:$40 sps:$4 sm:$0xff]   ;;  %v3944_v31 = vld [vmem:[#allocation6 + $0x790] ss:$40 sps:$4 sm:$0xff]  }
 0x2ac   :  { %2675 = vmatprep.subr.bf16.mxu0 %v3874_v32  ;;  %2718 = vmatprep.subr.bf16.mxu1 %v3877_v36  ;;  %v3947_v32 = vld [vmem:[#allocation6 + $0x798] ss:$40 sps:$4 sm:$0xff]   ;;  %v3952_v36 = vld [vmem:[#allocation6 + $0x754] ss:$40 sps:$4 sm:$0xff]  }
 0x2af   :  { %2676 = vmatpush1.bf16.msra.mxu0 %v3872_v54  ;;  %2719 = vmatpush1.bf16.msra.mxu1 %v3875_v37  ;;  %v3950_v54 = vld [vmem:[#allocation6 + $0x750] ss:$40 sps:$4 sm:$0xff]   ;;  %v3955_v37 = vld [vmem:[#allocation6 + $0x704] ss:$40 sps:$4 sm:$0xff]  }
 0x2b0   :  { %2677 = vmatprep.subr.bf16.mxu0 %v3880_v38  ;;  %2720 = vmatprep.subr.bf16.mxu1 %v3883_v39  ;;  %v3953_v38 = vld [vmem:[#allocation6 + $0x700] ss:$40 sps:$4 sm:$0xff]   ;;  %v3958_v39 = vld [vmem:[#allocation6 + $0x6b4] ss:$40 sps:$4 sm:$0xff]  }
 0x2b3   :  { %2678 = vmatpush1.bf16.msra.mxu0 %v3878_v40  ;;  %2721 = vmatpush1.bf16.msra.mxu1 %v3881_v41  ;;  %v3956_v40 = vld [vmem:[#allocation6 + $0x6b0] ss:$40 sps:$4 sm:$0xff]   ;;  %v3961_v41 = vld [vmem:[#allocation6 + $0x664] ss:$40 sps:$4 sm:$0xff]  }
 0x2b4   :  { %2679 = vmatprep.subr.bf16.mxu0 %v3886_v43  ;;  %2722 = vmatprep.subr.bf16.mxu1 %v3889_v47  ;;  %v3959_v43 = vld [vmem:[#allocation6 + $0x660] ss:$40 sps:$4 sm:$0xff]   ;;  %v3964_v47 = vld [vmem:[#allocation6 + $0x614] ss:$40 sps:$4 sm:$0xff]  }
 0x2b7   :  { %2680 = vmatpush1.bf16.msra.mxu0 %v3884_v48  ;;  %2723 = vmatpush1.bf16.msra.mxu1 %v3887_v49  ;;  %v3962_v48 = vld [vmem:[#allocation6 + $0x610] ss:$40 sps:$4 sm:$0xff]   ;;  %v3967_v49 = vld [vmem:[#allocation6 + $0x5c4] ss:$40 sps:$4 sm:$0xff]  }
 0x2b8   :  { %2681 = vmatprep.subr.bf16.mxu0 %v3892_v50  ;;  %2724 = vmatprep.subr.bf16.mxu1 %v3895_v55  ;;  %v3965_v50 = vld [vmem:[#allocation6 + $0x5c0] ss:$40 sps:$4 sm:$0xff]   ;;  %v3970_v55 = vld [vmem:[#allocation6 + $0x574] ss:$40 sps:$4 sm:$0xff]  }
 0x2bb   :  { %2682 = vmatpush1.bf16.msra.mxu0 %v3890_v57  ;;  %2725 = vmatpush1.bf16.msra.mxu1 %v3893_v58  ;;  %v3973_v57 = vld [vmem:[#allocation6 + $0x524] ss:$40 sps:$4 sm:$0xff]   ;;  %v3971_v58 = vld [vmem:[#allocation6 + $0x520] ss:$40 sps:$4 sm:$0xff]  }
 0x2bc   :  { %2683 = vmatprep.subr.bf16.mxu0 %v3898_v59  ;;  %2726 = vmatprep.subr.bf16.mxu1 %v3901_v42  ;;  %v3976_v59 = vld [vmem:[#allocation6 + $0x9d4] ss:$40 sps:$4 sm:$0xff]   ;;  %v3974_v42 = vld [vmem:[#allocation6 + $0x9d0] ss:$40 sps:$4 sm:$0xff]  }
 0x2bf   :  { %2684 = vmatpush1.bf16.msra.mxu0 %v3896_v60  ;;  %2727 = vmatpush1.bf16.msra.mxu1 %v3899_v61  ;;  %v3979_v60 = vld [vmem:[#allocation6 + $0x984] ss:$40 sps:$4 sm:$0xff]   ;;  %v3977_v61 = vld [vmem:[#allocation6 + $0x980] ss:$40 sps:$4 sm:$0xff]  }
 0x2c0   :  { %2685 = vmatprep.subr.bf16.mxu0 %v3904_v62  ;;  %2728 = vmatprep.subr.bf16.mxu1 %v3907_v63  ;;  %v3982_v62 = vld [vmem:[#allocation6 + $0x934] ss:$40 sps:$4 sm:$0xff]   ;;  %v3980_v63 = vld [vmem:[#allocation6 + $0x930] ss:$40 sps:$4 sm:$0xff]  }
 0x2c3   :  { %2686 = vmatpush2.bf16.msra.mxu0 %v3902_v0  ;;  %2729 = vmatpush2.bf16.msra.mxu1 %v3905_v1  ;;  %v3985_v0 = vld [vmem:[#allocation6 + $0x8e4] ss:$40 sps:$4 sm:$0xff]   ;;  %v3983_v1 = vld [vmem:[#allocation6 + $0x8e0] ss:$40 sps:$4 sm:$0xff]  }
 0x2c4   :  { %2687 = vmatprep.subr.bf16.mxu0 %v3910_v52  ;;  %2730 = vmatprep.subr.bf16.mxu1 %v3913_v3  ;;  %v3988_v52 = vld [vmem:[#allocation6 + $0x894] ss:$40 sps:$4 sm:$0xff]   ;;  %v3986_v3 = vld [vmem:[#allocation6 + $0x890] ss:$40 sps:$4 sm:$0xff]  }
 0x2c7   :  { %2688 = vmatpush2.bf16.msra.mxu0 %v3908_v4  ;;  %2731 = vmatpush2.bf16.msra.mxu1 %v3911_v51  ;;  %v3991_v4 = vld [vmem:[#allocation6 + $0x844] ss:$40 sps:$4 sm:$0xff]   ;;  %v3989_v51 = vld [vmem:[#allocation6 + $0x840] ss:$40 sps:$4 sm:$0xff]  }
 0x2c8   :  { %2689 = vmatprep.subr.bf16.mxu0 %v3916_v5  ;;  %2732 = vmatprep.subr.bf16.mxu1 %v3919_v7  ;;  %v3994_v5 = vld [vmem:[#allocation6 + $0x7f4] ss:$40 sps:$4 sm:$0xff]   ;;  %v3992_v7 = vld [vmem:[#allocation6 + $0x7f0] ss:$40 sps:$4 sm:$0xff]  }
 0x2cb   :  { %2690 = vmatpush2.bf16.msra.mxu0 %v3914_v8  ;;  %2733 = vmatpush2.bf16.msra.mxu1 %v3917_v9  ;;  %v3997_v8 = vld [vmem:[#allocation6 + $0x7a4] ss:$40 sps:$4 sm:$0xff]   ;;  %v3995_v9 = vld [vmem:[#allocation6 + $0x7a0] ss:$40 sps:$4 sm:$0xff]  }
 0x2cc   :  { %2691 = vmatprep.subr.bf16.mxu0 %v3922_v10  ;;  %2734 = vmatprep.subr.bf16.mxu1 %v3925_v11  ;;  %v3998_v10 = vld [vmem:[#allocation9 + $0x78] sm:$0xff]  }
 0x2cd   :  { %v3999_v11 = vld [vmem:[#allocation9 + $0x38] sm:$0xff]  }
 0x2cf   :  { %2692 = vmatpush2.bf16.msra.mxu0 %v3920_v12  ;;  %2735 = vmatpush2.bf16.msra.mxu1 %v3923_v13  ;;  %v4000_v12 = vld [vmem:[#allocation9 + $0x70] sm:$0xff]  }
 0x2d0   :  { %2693 = vmatprep.subr.bf16.mxu0 %v3928_v14  ;;  %2736 = vmatprep.subr.bf16.mxu1 %v3931_v15  ;;  %v4001_v13 = vld [vmem:[#allocation9 + $0x30] sm:$0xff]   ;;  %v4002_v14 = vld [vmem:[#allocation9 + $0x68] sm:$0xff]  }
 0x2d1   :  { %v4003_v15 = vld [vmem:[#allocation9 + $0x28] sm:$0xff]  }
 0x2d3   :  { %2694 = vmatpush2.bf16.msra.mxu0 %v3926_v16  ;;  %2737 = vmatpush2.bf16.msra.mxu1 %v3929_v17  ;;  %v4004_v16 = vld [vmem:[#allocation9 + $0x60] sm:$0xff]  }
 0x2d4   :  { %2695 = vmatprep.subr.bf16.mxu0 %v3934_v19  ;;  %2738 = vmatprep.subr.bf16.mxu1 %v3937_v21  ;;  %v4005_v17 = vld [vmem:[#allocation9 + $0x20] sm:$0xff]   ;;  %v4006_v19 = vld [vmem:[#allocation9 + $0x58] sm:$0xff]  }
 0x2d5   :  { %v4007_v21 = vld [vmem:[#allocation9 + $0x18] sm:$0xff]  }
 0x2d7   :  { %2696 = vmatpush2.bf16.msra.mxu0 %v3932_v22  ;;  %2739 = vmatpush2.bf16.msra.mxu1 %v3935_v24  ;;  %v4009_v22 = vld [vmem:[#allocation9 + $0x10] sm:$0xff]   ;;  %v4010_v24 = vld [vmem:[#allocation9 + $0x48] sm:$0xff]  }
 0x2d8   :  { %2697 = vmatprep.subr.bf16.mxu0 %v3940_v25  ;;  %2740 = vmatprep.subr.bf16.mxu1 %v3943_v26  ;;  %v4011_v25 = vld [vmem:[#allocation9 + $0x8] sm:$0xff]   ;;  %v4012_v26 = vld [vmem:[#allocation9 + $0x40] sm:$0xff]  }
 0x2db   :  { %2698 = vmatpush2.bf16.msra.mxu0 %v3938_v27  ;;  %2741 = vmatpush2.bf16.msra.mxu1 %v3941_v28  ;;  %v4013_v27 = vld [vmem:[#allocation9] sm:$0xff]  }
 0x2dc   :  { %2699 = vmatprep.subr.bf16.mxu0 %v3946_v29  ;;  %2742 = vmatprep.subr.bf16.mxu1 %v3949_v30 }
 0x2df   :  { %2700 = vmatpush2.bf16.msra.mxu0 %v3944_v31  ;;  %2743 = vmatpush2.bf16.msra.mxu1 %v3947_v32 }
 0x2e0   :  { %2755 = vmatprep.subr.bf16.mxu0 %v3952_v36  ;;  %3446 = vmatprep.subr.bf16.mxu1 %v3998_v10 }
 0x2e2   :  { %2702 = vmatmul.mubr.bf16.vlgmr.msra.gmra.mxu0 %v4360_v23  ;;  %2745 = vmatmul.mubr.bf16.vlgmr.msra.gmra.mxu1 %v4360_v23 }
 0x2e3   :  { %2756 = vmatpush1.bf16.msra.mxu0 %v3950_v54  ;;  %2787 = vmatprep.mubr.bf16.mxu0 %v4358_v20  ;;  %v3968_v20 = vld [vmem:[#allocation6 + $0x570] ss:$40 sps:$4 sm:$0xff]  }
 0x2e4   :  { %2757 = vmatprep.subr.bf16.mxu0 %v3955_v37  ;;  %3447 = vmatpush3.bf16.msra.mxu1 %v3999_v11 }
 0x2e5   :  { %3448 = vmatprep.subr.bf16.mxu1 %v4000_v12 }
 0x2e7   :  { %2758 = vmatpush1.bf16.msra.mxu0 %v3953_v38 }
 0x2e8   :  { %2759 = vmatprep.subr.bf16.mxu0 %v3958_v39  ;;  %3449 = vmatpush3.bf16.msra.mxu1 %v4001_v13 }
 0x2e9   :  { %3450 = vmatprep.subr.bf16.mxu1 %v4002_v14 }
 0x2eb   :  { %2760 = vmatpush1.bf16.msra.mxu0 %v3956_v40 }
 0x2ec   :  { %2761 = vmatprep.subr.bf16.mxu0 %v3961_v41  ;;  %3451 = vmatpush3.bf16.msra.mxu1 %v4003_v15 }
 0x2ed   :  { %3452 = vmatprep.subr.bf16.mxu1 %v4004_v16 }
 0x2ef   :  { %2762 = vmatpush1.bf16.msra.mxu0 %v3959_v43 }
 0x2f0   :  { %2763 = vmatprep.subr.bf16.mxu0 %v3964_v47  ;;  %3453 = vmatpush3.bf16.msra.mxu1 %v4005_v17 }
 0x2f1   :  { %3454 = vmatprep.subr.bf16.mxu1 %v4006_v19  ;;  %v2863_v19 = vld [vmem:[#allocation7 + $0x2] sm:$0x3] }
 0x2f3   :  { %2764 = vmatpush1.bf16.msra.mxu0 %v3962_v48 }
 0x2f4   :  { %2765 = vmatprep.subr.bf16.mxu0 %v3967_v49  ;;  %3455 = vmatpush3.bf16.msra.mxu1 %v4007_v21 }
 0x2f7   :  { %2766 = vmatpush1.bf16.msra.mxu0 %v3965_v50 }
 0x2f8   :  { %2767 = vmatprep.subr.bf16.mxu0 %v3970_v55 }
 0x2fb   :  { %2768 = vmatpush1.bf16.msra.mxu0 %v3968_v20 }
 0x2fc   :  { %2769 = vmatprep.subr.bf16.mxu0 %v3973_v57 }
 0x2ff   :  { %2770 = vmatpush1.bf16.msra.mxu0 %v3971_v58 }
 0x300   :  { %2771 = vmatprep.subr.bf16.mxu0 %v3976_v59 }
 0x303   :  { %2772 = vmatpush2.bf16.msra.mxu0 %v3974_v42 }
 0x304   :  { %2773 = vmatprep.subr.bf16.mxu0 %v3979_v60 }
 0x307   :  { %2774 = vmatpush2.bf16.msra.mxu0 %v3977_v61 }
 0x308   :  { %2775 = vmatprep.subr.bf16.mxu0 %v3982_v62 }
 0x30b   :  { %2776 = vmatpush2.bf16.msra.mxu0 %v3980_v63 }
 0x30c   :  { %2777 = vmatprep.subr.bf16.mxu0 %v3985_v0 }
 0x30f   :  { %2778 = vmatpush2.bf16.msra.mxu0 %v3983_v1 }
 0x310   :  { %2779 = vmatprep.subr.bf16.mxu0 %v3988_v52 }
 0x313   :  { %2780 = vmatpush2.bf16.msra.mxu0 %v3986_v3 }
 0x314   :  { %2781 = vmatprep.subr.bf16.mxu0 %v3991_v4 }
 0x317   :  { %2782 = vmatpush2.bf16.msra.mxu0 %v3989_v51 }
 0x318   :  { %2783 = vmatprep.subr.bf16.mxu0 %v3994_v5 }
 0x31b   :  { %2784 = vmatpush2.bf16.msra.mxu0 %v3992_v7 }
 0x31c   :  { %2785 = vmatprep.subr.bf16.mxu0 %v3997_v8 }
 0x31f   :  { %2786 = vmatpush2.bf16.msra.mxu0 %v3995_v9 }
 0x322   :  { %2788 = vmatmul.mubr.bf16.vlgmr.msra.gmra.mxu0 %v4360_v23  ;;  %v4008_v23 = vld [vmem:[#allocation9 + $0x50] sm:$0xff]  }
 0x323   :  { %3456 = vmatprep.subr.bf16.mxu1 %v4008_v23 }
 0x324   :  { %3457 = vmatpush3.bf16.msra.mxu1 %v4009_v22 }
 0x325   :  { %3458 = vmatprep.subr.bf16.mxu1 %v4010_v24 }
 0x328   :  { %3459 = vmatpush3.bf16.msra.mxu1 %v4011_v25 }
 0x329   :  { %3460 = vmatprep.subr.bf16.mxu1 %v4012_v26 }
 0x32c   :  { %3461 = vmatpush3.bf16.msra.mxu1 %v4013_v27 }
 0x362   :  { %v2660_v28 = vpop.f32.mrf.mxu1  ;;  %v2617_v29 = vpop.f32.mrf.mxu0 }
 0x363   :  { %v2798_v49 = vrot.slane %v2617_v29, 6  ;;  %v2810_v55 = vrot.slane %v2660_v28, 7  ;;  %v2868_v28 = vrot.slane %v2863_v19, %v4238_v35 }
 0x364   :  { %v2662_v30 = vpop.f32.mrf.mxu1  ;;  %v2619_v31 = vpop.f32.mrf.mxu0 }
 0x365   :  { %v2799_v57 = vrot.slane %v2619_v31, 6  ;;  %v2811_v42 = vrot.slane %v2662_v30, 7 }
 0x366   :  { %v2664_v32 = vpop.f32.mrf.mxu1  ;;  %v2621_v36 = vpop.f32.mrf.mxu0 }
 0x367   :  { %v2800_v41 = vrot.slane %v2621_v36, 6  ;;  %v2812_v47 = vrot.slane %v2664_v32, 7  ;;  %v2872_v32 = vrot.slane %v2863_v19, %v4235_v34 }
 0x368   :  { %v2666_v54 = vpop.f32.mrf.mxu1  ;;  %v2623_v38 = vpop.f32.mrf.mxu0 }
 0x369   :  { %v2801_v50 = vrot.slane %v2623_v38, 6  ;;  %v2813_v20 = vrot.slane %v2666_v54, 7  ;;  %v2804_v58 = vsel %vm1504_vm1, %v2800_v41, %v2798_v49  ;;  %v2816_v60 = vsel %vm1525_vm2, %v2812_v47, %v2810_v55 }
 0x36a   :  { %v2802_v63 = vsel %vm1504_vm1, %v2798_v49, %v2800_v41  ;;  %v2814_v0 = vsel %vm1525_vm2, %v2810_v55, %v2812_v47  ;;  %v2806_v52 = vsel %vm1511_vm3, %v2804_v58, 0.0  ;;  %v2818_v9 = vsel %vm1532_vm4, %v2816_v60, 0.0 }
 0x36b   :  { %v2805_v62 = vsel %vm1504_vm1, %v2801_v50, %v2799_v57  ;;  %v2817_v3 = vsel %vm1525_vm2, %v2813_v20, %v2811_v42  ;;  %v2803_v5 = vsel %vm1504_vm1, %v2799_v57, %v2801_v50  ;;  %v2815_v7 = vsel %vm1525_vm2, %v2811_v42, %v2813_v20 }
 0x36c   :  { %v2807_v10 = vsel %vm1511_vm3, %v2805_v62, 0.0  ;;  %v2808_v11 = vsel %vm1512_vm5, %v2802_v63, 0.0  ;;  %v2820_v12 = vsel %vm1533_vm6, %v2814_v0, 0.0  ;;  %v2819_v13 = vsel %vm1532_vm4, %v2817_v3, 0.0 }
 0x36d   :  { %v2809_v44 = vsel %vm1512_vm5, %v2803_v5, 0.0  ;;  %v2821_v21 = vsel %vm1533_vm6, %v2815_v7, 0.0  ;;  %v2822_v23 = vadd.f32 %v2818_v9, %v2806_v52  ;;  %v2824_v22 = vadd.f32 %v2820_v12, %v2808_v11 }
 0x36e   :  { %v2823_v26 = vadd.f32 %v2819_v13, %v2807_v10  ;;  %v2825_v30 = vadd.f32 %v2821_v21, %v2809_v44 }
 0x3a2   :  { %v2746_v37 = vpop.f32.mrf.mxu1  ;;  %v2703_v39 = vpop.f32.mrf.mxu0 }
 0x3a3   :  { %v2830_v4 = vrot.slane %v2746_v37, 1  ;;  %v2826_v53 = vadd.f32 %v2822_v23, %v2703_v39 }
 0x3a4   :  { %v2748_v40 = vpop.f32.mrf.mxu1  ;;  %v2705_v43 = vpop.f32.mrf.mxu0 }
 0x3a5   :  { %v2831_v14 = vrot.slane %v2748_v40, 1  ;;  %v2827_v40 = vadd.f32 %v2823_v26, %v2705_v43 }
 0x3a6   :  { %v2750_v48 = vpop.f32.mrf.mxu1  ;;  %v2707_v59 = vpop.f32.mrf.mxu0 }
 0x3a7   :  { %v2832_v1 = vrot.slane %v2750_v48, 1  ;;  %v2828_v29 = vadd.f32 %v2824_v22, %v2707_v59 }
 0x3a8   :  { %v2752_v61 = vpop.f32.mrf.mxu1  ;;  %v2709_v51 = vpop.f32.mrf.mxu0 }
 0x3a9   :  { %v2833_v8 = vrot.slane %v2752_v61, 1  ;;  %v2834_v15 = vsel %vm1554_vm7, %v2830_v4, %v2832_v1  ;;  %v2836_v16 = vsel %vm1554_vm7, %v2832_v1, %v2830_v4  ;;  %v2829_v48 = vadd.f32 %v2825_v30, %v2709_v51 }
 0x3aa   :  { %v2838_v27 = vsel %vm1563_vm8, %v2834_v15, 0.0  ;;  %v2840_v46 = vsel %vm1564_vm9, %v2836_v16, 0.0 }
 0x3ab   :  { %v2835_v45 = vsel %vm1554_vm7, %v2831_v14, %v2833_v8  ;;  %v2837_v24 = vsel %vm1554_vm7, %v2833_v8, %v2831_v14  ;;  %v2842_v41 = vadd.f32 %v2838_v27, %v2826_v53  ;;  %v2844_v47 = vadd.f32 %v2840_v46, %v2828_v29 }
 0x3ac   :  { %v2839_v36 = vsel %vm1563_vm8, %v2835_v45, 0.0  ;;  %v2841_v54 = vsel %vm1564_vm9, %v2837_v24, 0.0 }
 0x3ad   :  { %v2843_v56 = vadd.f32 %v2839_v36, %v2827_v40  ;;  %v2845_v55 = vadd.f32 %v2841_v54, %v2829_v48 }
 0x3e2   :  { %v2789_v17 = vpop.f32.mrf.mxu0 }
 0x3e3   :  { %v2846_v37 = vrot.slane %v2789_v17, 2 }
 0x3e4   :  { %v2791_v25 = vpop.f32.mrf.mxu0 }
 0x3e5   :  { %v2847_v35 = vrot.slane %v2791_v25, 2 }
 0x3e6   :  { %v2793_v31 = vpop.f32.mrf.mxu0 }
 0x3e7   :  { %v2848_v38 = vrot.slane %v2793_v31, 2 }
 0x3e8   :  { %v2795_v49 = vpop.f32.mrf.mxu0 }
 0x3e9   :  { %v2850_v39 = vsel %vm1579_vm10, %v2846_v37, %v2848_v38  ;;  %v2852_v34 = vsel %vm1579_vm10, %v2848_v38, %v2846_v37  ;;  %v2849_v50 = vrot.slane %v2795_v49, 2 }
 0x3ea   :  { %v2854_v2 = vsel %vm1588_vm11, %v2850_v39, 0.0  ;;  %v2856_v43 = vsel %vm1589_vm12, %v2852_v34, 0.0 }
 0x3eb   :  { %v2858_v20 = vadd.f32 %v2854_v2, %v2842_v41  ;;  %v2860_v57 = vadd.f32 %v2856_v43, %v2844_v47  ;;  %v2851_v58 = vsel %vm1579_vm10, %v2847_v35, %v2849_v50  ;;  %v2853_v59 = vsel %vm1579_vm10, %v2849_v50, %v2847_v35 }
 0x3ec   :  { %v2855_v42 = vsel %vm1588_vm11, %v2851_v58, 0.0  ;;  %v2857_v60 = vsel %vm1589_vm12, %v2853_v59, 0.0 }
 0x3ed   :  { %v2875_v61 = vadd.f32 %v2868_v28, %v2858_v20  ;;  %v2877_v62 = vadd.f32 %v2868_v28, %v2860_v57  ;;  %v2859_v63 = vadd.f32 %v2855_v42, %v2843_v56  ;;  %v2861_v0 = vadd.f32 %v2857_v60, %v2845_v55 }
 0x3ef   :  { %v2876_v1 = vadd.f32 %v2872_v32, %v2859_v63  ;;  %v2878_v52 = vadd.f32 %v2872_v32, %v2861_v0  ;;  %v2879_v3 = vmax.f32 %v2875_v61, 0.0  ;;  %v2881_v4 = vmax.f32 %v2877_v62, 0.0 }
 0x3f1   :  { %v2880_v51 = vmax.f32 %v2876_v1, 0.0  ;;  %v2882_v5 = vmax.f32 %v2878_v52, 0.0  ;;  %v2883_v8 = vpack.c.bf16 %v2881_v4, %v2879_v3 }
 0x3f3   :  { %v2884_v7 = vpack.c.bf16 %v2882_v5, %v2880_v51 }
 0x3f5   :  { %3052 = vmatprep.mubr.bf16.mxu1 %v2884_v7 }
 0x3f6   :  { %3053 = vmatmul.mubr.bf16.vlgmr.msra.gmra.mxu1 %v2883_v8 }
 0x4b6   :  { %v3462_v33 = vpop.f32.mrf.mxu1 }
 0x4b8   :  { %v3463_v6 = vpop.f32.mrf.mxu1 }
 0x4b9   :  { %v3464_v10 = vadd.f32 %v3463_v6, %v3462_v33 }
 0x4ba   :  { %v3465_v9 = vpop.f32.mrf.mxu1 }
 0x4bb   :  { %v3055_v13 = vadd.f32 %v3464_v10, %v3429_v18 }
 0x4bc   :  { %v3466_v11 = vpop.f32.mrf.mxu1 }
 0x4bd   :  { %v3467_v12 = vadd.f32 %v3466_v11, %v3465_v9 }
 0x4bf   :  { %v3058_v14 = vadd.f32 %v3467_v12, %v3429_v18 }
 0x4c1   :  { %v3061_v15 = vmax.f32 %v3055_v13, %v3058_v14 }
 0x4c3   :  { %v3062_v16 = vsub.f32 %v3055_v13, %v3061_v15  ;;  %v3065_v17 = vsub.f32 %v3058_v14, %v3061_v15 }
 0x4c5   :  { %v3063_v19 = vmul.f32 1.442695, %v3062_v16  ;;  %v3066_v44 = vmul.f32 1.442695, %v3065_v17 }
 0x4c7   :  { %4014 = vpow2.f32 %v3063_v19 }
 0x4c8   :  { %4016 = vpow2.f32 %v3066_v44 }
 0x4d4   :  { %v4015_v21 = vpop.eup %4014 }
 0x4d5   :  { %v4017_v23 = vpop.eup %4016 }
 0x4d6   :  { %v3068_v22 = vadd.f32 %v4017_v23, %v4015_v21 }
 0x4d8   :  { %4018 = vlog2.f32 %v3068_v22 }
 0x4e5   :  { %v4019_v45 = vpop.eup %4018 }
 0x4e6   :  { %v3070_v24 = vmul.f32 0.6931472, %v4019_v45 }
 0x4e8   :  { %v3071_v25 = vadd.f32 %v3070_v24, %v3061_v15 }
 0x4ea   :  { %v3072_v26 = vsub.f32 %v3055_v13, %v3071_v25  ;;  %v3074_v27 = vsub.f32 %v3058_v14, %v3071_v25 }
 0x4ec   :  { %3073 = vst [vmem:[%s4451_s7] sm:$0xff] %v3072_v26  ;;  %3075 = vst [vmem:[%s4451_s7 + $0x8] sm:$0xff] %v3074_v27 }
 0x4ed   :  { %3080 = vsyncpa [#allocation3], 1 }
 0x4ee   :  { %3081 = vsyncpa [#allocation5], 1 }
 0x4ef   :  { %3082 = vsyncpa [#allocation8], 1 }
 0x4f0   :  { %3083 = vsyncpa [#allocation11], 1 }

</bundles_post_ra>
